<compile_context>
chip_gen: v5e
topology: v5e:2x2
jax: 0.10.0
libtpu: 0.0.40
codegen_flags: <defaults>
</compile_context>

<pallas_src>
import functools

import jax
import jax.numpy as jnp
from jax.experimental import pallas as pl
from jax.experimental.pallas import tpu as pltpu

F32 = jnp.float32


# --------------------------------------------------------------------------- #
# Fused kernel: NSPTExtractor + downscale Linear + custom LSTM recurrence      #
# --------------------------------------------------------------------------- #
def _regressor_kernel(x_ref, nspt_ref, conv_ref, lstm_ref, out_ref, *,
                      ds, nf, hd, H, O):
    # ---- hoisted loads: every input / parameter slab is read from VMEM exactly once ----
    conv = conv_ref[...]          # packed conv params  (3*Cin+1+3*hd+1+3*hd+1, nf)
    lw = lstm_ref[...]            # packed LSTM params  (F-1+1+(ds+1+nf+H)+1, H+O)
    x = x_ref[...]                # (S, B, F)  time-major input
    nspt = nspt_ref[...]          # (L, B, Cin) length-major NSPT input

    S, B, F = x.shape
    L, _, Cin = nspt.shape
    HO = H + O

    # -- unpack conv slab (static offsets, lane sub-slices from 0) --
    r = 0
    w1f = conv[r:r + 3 * Cin, :hd]; r += 3 * Cin
    b1 = conv[r:r + 1, :hd];        r += 1
    w2f = conv[r:r + 3 * hd, :hd];  r += 3 * hd
    b2 = conv[r:r + 1, :hd];        r += 1
    w3f = conv[r:r + 3 * hd, :nf];  r += 3 * hd
    b3 = conv[r:r + 1, :nf]

    # -- unpack LSTM slab (static offsets) --
    r = 0
    w_ds = lw[r:r + F - 1, :ds];        r += F - 1    # downscale Linear weight (F-1, ds)
    b_ds = lw[r:r + 1, :ds];            r += 1
    w_x = lw[r:r + ds + 1 + nf, :];     r += ds + 1 + nf   # input-side rows of fused (i2h|i2o)
    w_h = lw[r:r + H, :];               r += H             # hidden-side rows of fused (i2h|i2o)
    b_l = lw[r:r + 1, :]                                   # fused bias (b_ih|b_io)

    # ---- NSPTExtractor: Conv1d(k=3, s=2, p=1) + ReLU as one im2col matmul per stage ----
    def conv_stage(seq, w, b):
        # seq: (Ls, B, C) length-major.  w: (3*C, Cout) tap-major (k*C + c).  b: (1, Cout)
        Ls, Bb, C = seq.shape
        if Ls % 2 == 1:  # odd length: the right zero-padding column becomes a real zero row
            seq = jnp.concatenate([seq, jnp.zeros((1, Bb, C), F32)], axis=0)
            Ls += 1
        lo = Ls // 2                     # == (Ls-1)//2 + 1 outputs for k=3, s=2, p=1
        sr = seq.reshape(lo, 2, Bb, C)   # leading-dim split only (cheap)
        even = sr[:, 0]                                        # x[2t]   (center tap, k=1)
        odd = sr[:, 1]                                         # x[2t+1] (right tap,  k=2)
        prev = jnp.concatenate([jnp.zeros((1, Bb, C), F32),    # x[2t-1] (left tap,   k=0)
                                odd[:-1]], axis=0)
        cols = jnp.concatenate([prev, even, odd], axis=-1)     # (lo, B, 3*C) im2col slab
        y = jnp.dot(cols.reshape(lo * Bb, 3 * C), w,
                    preferred_element_type=F32) + b
        return jnp.maximum(y, 0.0).reshape(lo, Bb, -1)

    g1 = conv_stage(nspt, w1f, b1)       # (L/2, B, hd)
    g2 = conv_stage(g1, w2f, b2)         # (L/4, B, hd)
    g3 = conv_stage(g2, w3f, b3)         # (L/8, B, nf)
    nspt_feat = jnp.mean(g3, axis=0)     # (B, nf)  == torch.mean(x, dim=2)

    # ---- hoisted input-side projections (everything except h @ W_h), batched over all steps ----
    f1 = x[:, :, :F - 1].reshape(S * B, F - 1)
    f2 = x[:, :, F - 1:].reshape(S * B, 1)
    f1d = jnp.dot(f1, w_ds, preferred_element_type=F32) + b_ds            # downscale Linear
    pre_in = (jnp.dot(f1d, w_x[:ds, :], preferred_element_type=F32)
              + f2 * w_x[ds:ds + 1, :]            # rank-1 column: broadcast-mul, no K=1 matmul
              + b_l)                                                       # (S*B, H+O)
    npt_pre = jnp.dot(nspt_feat, w_x[ds + 1:, :], preferred_element_type=F32)   # (B, H+O)
    pre_x = pre_in.reshape(S, B, HO) + npt_pre[None, :, :]                 # (S, B, H+O)

    # ---- serial recurrence: one (B,H)x(H,H+O) matmul + gates per step; states live in vregs ----
    h = jnp.zeros((B, H), F32)           # LSTM.init_hidden -> zeros
    c = jnp.zeros((B, H), F32)
    outs = []
    for t in range(S):                   # statically unrolled (S is small)
        if t == 0:
            pre = pre_x[0]               # h == 0 -> hidden contribution is zero
        else:
            pre = pre_x[t] + jnp.dot(h, w_h, preferred_element_type=F32)
        pre_h = pre[:, :H]               # i2h(combined)
        pre_o = pre[:, H:]               # i2o(combined)
        gate = jax.nn.sigmoid(pre_o)     # input_gate == output_gate in the reference module
        c = gate * jnp.tanh(c) + (1.0 - gate) * jnp.tanh(pre_h)   # broadcasts (B,O=1) over (B,H)
        h = gate * jnp.tanh(c)
        outs.append(pre_o)               # output = i2o(combined) (no sigmoid)

    # single lane-dense store instead of S masked width-1 stores
    out_ref[...] = jnp.concatenate(outs, axis=1)     # (B, S*O)


# --------------------------------------------------------------------------- #
# Wrapper: pack params, fix layouts, single pallas_call                        #
# --------------------------------------------------------------------------- #
def _fuse_conv_weight(w):
    # PyTorch Conv1d weight (Cout, Cin, K=3) -> (K*Cin, Cout); row index = k*Cin + cin
    cout, cin, k = w.shape
    return jnp.transpose(w, (2, 1, 0)).reshape(k * cin, cout)


def regressor_forward(params, inp, nspt):
    """Forward pass of `Regressor` (units=1, downscale>0) as a single fused Pallas call."""
    B, S, F = inp.shape
    H = params["w_ih"].shape[0]
    O = params["w_io"].shape[0]
    ds = params["w_ds"].shape[0]
    nf = params["w3"].shape[0]
    hd = params["w1"].shape[0]
    HO = H + O
    # TODO(synk): units>1 (stacked LSTMs) and output_size>1 are not exercised by this config;
    # the reference module's gate broadcast itself requires output_size == 1.
    assert O == 1

    # ---- pack all conv params into one (rows, nf) slab -> one DMA ----
    def pad_c(a):
        return jnp.pad(a, ((0, 0), (0, nf - a.shape[1])))
    conv_slab = jnp.concatenate([
        pad_c(_fuse_conv_weight(params["w1"])), pad_c(params["b1"].reshape(1, -1)),
        pad_c(_fuse_conv_weight(params["w2"])), pad_c(params["b2"].reshape(1, -1)),
        pad_c(_fuse_conv_weight(params["w3"])), pad_c(params["b3"].reshape(1, -1)),
    ], axis=0).astype(F32)

    # ---- pack downscale Linear + column-fused (i2h|i2o) weights into one (rows, H+O) slab ----
    # combined column order: [downscaled(ds), last-feature(1), nspt(nf), hidden(H)]
    w_fused = jnp.concatenate([params["w_ih"].T, params["w_io"].T], axis=1)       # (ds+1+nf+H, H+O)
    b_fused = jnp.concatenate([params["b_ih"], params["b_io"]]).reshape(1, -1)    # (1, H+O)

    def pad_l(a):
        return jnp.pad(a, ((0, 0), (0, HO - a.shape[1])))
    lstm_slab = jnp.concatenate([
        pad_l(params["w_ds"].T), pad_l(params["b_ds"].reshape(1, -1)),
        w_fused, b_fused,
    ], axis=0).astype(F32)

    # time-major / length-major layouts so in-kernel per-step slices cut leading dims, not lanes
    x_seq = jnp.transpose(inp, (1, 0, 2)).astype(F32)     # (S, B, F)
    nspt_t = jnp.transpose(nspt, (2, 0, 1)).astype(F32)   # (L, B, Cin)

    kernel = functools.partial(_regressor_kernel, ds=ds, nf=nf, hd=hd, H=H, O=O)
    out2d = pl.pallas_call(
        kernel,
        out_shape=jax.ShapeDtypeStruct((B, S * O), F32),
        in_specs=[pl.BlockSpec(memory_space=pltpu.MemorySpace.VMEM)] * 4,
        out_specs=pl.BlockSpec(memory_space=pltpu.MemorySpace.VMEM),
    )(x_seq, nspt_t, conv_slab, lstm_slab)
    # TODO(synk): for production batch sizes add a grid over B with
    # dimension_semantics=("parallel",) so v7x's two TensorCores split the batch.
    return out2d.reshape(B, S, O)


# --------------------------------------------------------------------------- #
# Pure-JAX reference (mirrors the PyTorch module) for the in-script check      #
# --------------------------------------------------------------------------- #
def _reference_forward(params, inp, nspt):
    B, S, F = inp.shape
    H = params["w_ih"].shape[0]
    nf = params["w3"].shape[0]

    def conv1d_s2_p1(x, w, b):     # x: (B, Cin, L), w: (Cout, Cin, 3)
        Bb, Cin, L = x.shape
        xp = jnp.pad(x, ((0, 0), (0, 0), (1, 1)))
        L_out = (L - 1) // 2 + 1
        cols = jnp.stack([xp[:, :, 2 * t:2 * t + 3] for t in range(L_out)], axis=1)  # (B,Lo,Cin,3)
        y = jnp.einsum("blck,ock->bol", cols, w) + b[None, :, None]
        return jnp.maximum(y, 0.0)                                                    # (B,Cout,Lo)

    g = conv1d_s2_p1(nspt, params["w1"], params["b1"])
    g = conv1d_s2_p1(g, params["w2"], params["b2"])
    g = conv1d_s2_p1(g, params["w3"], params["b3"])
    nspt_feat = jnp.mean(g, axis=2)                                # (B, nf)

    f1 = inp[:, :, :-1] @ params["w_ds"].T + params["b_ds"]        # (B, S, ds)
    f2 = inp[:, :, -1:]
    xin = jnp.concatenate(
        [f1, f2, jnp.broadcast_to(nspt_feat[:, None, :], (B, S, nf))], axis=2)

    h = jnp.zeros((B, H), F32)
    c = jnp.zeros((B, H), F32)
    outs = []
    for t in range(S):
        comb = jnp.concatenate([xin[:, t, :], h], axis=1)
        pre_h = comb @ params["w_ih"].T + params["b_ih"]
        pre_o = comb @ params["w_io"].T + params["b_io"]
        gate = jax.nn.sigmoid(pre_o)
        c = gate * jnp.tanh(c) + (1.0 - gate) * jnp.tanh(pre_h)
        h = gate * jnp.tanh(c)
        outs.append(pre_o)
    return jnp.stack(outs, axis=1)                                 # (B, S, O)


# --------------------------------------------------------------------------- #
# Main                                                                         #
# --------------------------------------------------------------------------- #
if __name__ == "__main__":
    # Regressor(feature_size=5, hidden_size=[32], output_size=1,
    #           hidden_dim_nspt=8, out_feature_nspt=16, downscale=4, units=1)
    feature_size = 5
    hidden_size = 32
    output_size = 1
    downscale = 4
    hidden_dim_nspt = 8
    out_feature_nspt = 16
    B, S, L = 2, 8, 16

    key = jax.random.PRNGKey(0)
    ks = jax.random.split(key, 16)

    def init(k, shape, scale=0.1):
        return (scale * jax.random.normal(k, shape)).astype(F32)

    in_size = downscale + 1 + out_feature_nspt          # 21 (LSTM input size)
    params = {
        # NSPTExtractor conv weights (PyTorch Conv1d layout: (Cout, Cin, K))
        "w1": init(ks[0], (hidden_dim_nspt, 3, 3)),
        "b1": init(ks[1], (hidden_dim_nspt,)),
        "w2": init(ks[2], (hidden_dim_nspt, hidden_dim_nspt, 3)),
        "b2": init(ks[3], (hidden_dim_nspt,)),
        "w3": init(ks[4], (out_feature_nspt, hidden_dim_nspt, 3)),
        "b3": init(ks[5], (out_feature_nspt,)),
        # downscale_input: Linear(feature_size - 1, downscale)
        "w_ds": init(ks[6], (downscale, feature_size - 1)),
        "b_ds": init(ks[7], (downscale,)),
        # LSTM unit 0: i2h = Linear(in_size + H, H), i2o = Linear(in_size + H, O)
        "w_ih": init(ks[8], (hidden_size, in_size + hidden_size)),
        "b_ih": init(ks[9], (hidden_size,)),
        "w_io": init(ks[10], (output_size, in_size + hidden_size)),
        "b_io": init(ks[11], (output_size,)),
    }

    inp = jax.random.normal(ks[12], (B, S, feature_size), dtype=F32)   # (batch, seq, feature)
    nspt = jax.random.normal(ks[13], (B, 3, L), dtype=F32)             # (batch, channels, length)

    out = jax.jit(regressor_forward)(params, inp, nspt)
    out = jax.block_until_ready(out)
    assert out.shape == (B, S, output_size)
    assert out.dtype == F32

    ref = _reference_forward(params, inp, nspt)
    err = float(jnp.max(jnp.abs(out - ref)))
    assert err < 1e-3, f"mismatch vs pure-JAX reference: max abs err = {err}"

    # TODO(synk): `print_vector` debug-printing path of Regressor.forward is omitted (no-op for compute).
    print("KERNEL_OK")
</pallas_src>

<mosaic_0001>
module attributes {stable_mosaic.version = 11 : i64} {
  func.func @_regressor_kernel(%arg0: memref<8x2x5xf32, #tpu.memory_space<vmem>>, %arg1: memref<16x2x3xf32, #tpu.memory_space<vmem>>, %arg2: memref<60x16xf32, #tpu.memory_space<vmem>>, %arg3: memref<59x33xf32, #tpu.memory_space<vmem>>, %arg4: memref<2x8xf32, #tpu.memory_space<vmem>>) attributes {dimension_semantics = [], scalar_prefetch = 0 : i64, scratch_operands = 0 : i64, tpu.core_type = #tpu.core_type<tc>} {
    %c0 = arith.constant 0 : index
    %c0_0 = arith.constant 0 : index
    %0 = vector.load %arg2[%c0, %c0_0] : memref<60x16xf32, #tpu.memory_space<vmem>>, vector<60x16xf32>
    %c0_1 = arith.constant 0 : index
    %c0_2 = arith.constant 0 : index
    %1 = vector.load %arg3[%c0_1, %c0_2] : memref<59x33xf32, #tpu.memory_space<vmem>>, vector<59x33xf32>
    %c0_3 = arith.constant 0 : index
    %c0_4 = arith.constant 0 : index
    %c0_5 = arith.constant 0 : index
    %2 = vector.load %arg0[%c0_3, %c0_4, %c0_5] : memref<8x2x5xf32, #tpu.memory_space<vmem>>, vector<8x2x5xf32>
    %c0_6 = arith.constant 0 : index
    %c0_7 = arith.constant 0 : index
    %c0_8 = arith.constant 0 : index
    %3 = vector.load %arg1[%c0_6, %c0_7, %c0_8] : memref<16x2x3xf32, #tpu.memory_space<vmem>>, vector<16x2x3xf32>
    %4 = vector.extract_strided_slice %0 {offsets = [0, 0], sizes = [9, 8], strides = [1, 1]} : vector<60x16xf32> to vector<9x8xf32>
    %5 = vector.extract_strided_slice %0 {offsets = [9, 0], sizes = [1, 8], strides = [1, 1]} : vector<60x16xf32> to vector<1x8xf32>
    %6 = vector.extract_strided_slice %0 {offsets = [10, 0], sizes = [24, 8], strides = [1, 1]} : vector<60x16xf32> to vector<24x8xf32>
    %7 = vector.extract_strided_slice %0 {offsets = [34, 0], sizes = [1, 8], strides = [1, 1]} : vector<60x16xf32> to vector<1x8xf32>
    %8 = vector.extract_strided_slice %0 {offsets = [35, 0], sizes = [24, 16], strides = [1, 1]} : vector<60x16xf32> to vector<24x16xf32>
    %9 = vector.extract_strided_slice %0 {offsets = [59, 0], sizes = [1, 16], strides = [1, 1]} : vector<60x16xf32> to vector<1x16xf32>
    %10 = vector.extract_strided_slice %1 {offsets = [0, 0], sizes = [4, 4], strides = [1, 1]} : vector<59x33xf32> to vector<4x4xf32>
    %11 = vector.extract_strided_slice %1 {offsets = [4, 0], sizes = [1, 4], strides = [1, 1]} : vector<59x33xf32> to vector<1x4xf32>
    %12 = vector.extract_strided_slice %1 {offsets = [5, 0], sizes = [21, 33], strides = [1, 1]} : vector<59x33xf32> to vector<21x33xf32>
    %13 = vector.extract_strided_slice %1 {offsets = [26, 0], sizes = [32, 33], strides = [1, 1]} : vector<59x33xf32> to vector<32x33xf32>
    %14 = vector.extract_strided_slice %1 {offsets = [58, 0], sizes = [1, 33], strides = [1, 1]} : vector<59x33xf32> to vector<1x33xf32>
    %15 = vector.shape_cast %3 : vector<16x2x3xf32> to vector<8x2x2x3xf32>
    %16 = vector.extract_strided_slice %15 {offsets = [0, 0, 0, 0], sizes = [8, 1, 2, 3], strides = [1, 1, 1, 1]} : vector<8x2x2x3xf32> to vector<8x1x2x3xf32>
    %17 = vector.shape_cast %16 : vector<8x1x2x3xf32> to vector<8x2x3xf32>
    %18 = vector.extract_strided_slice %15 {offsets = [0, 1, 0, 0], sizes = [8, 1, 2, 3], strides = [1, 1, 1, 1]} : vector<8x2x2x3xf32> to vector<8x1x2x3xf32>
    %19 = vector.shape_cast %18 : vector<8x1x2x3xf32> to vector<8x2x3xf32>
    %cst = arith.constant 0.000000e+00 : f32
    %20 = vector.broadcast %cst : f32 to vector<1x2x3xf32>
    %21 = vector.extract_strided_slice %19 {offsets = [0, 0, 0], sizes = [7, 2, 3], strides = [1, 1, 1]} : vector<8x2x3xf32> to vector<7x2x3xf32>
    %22 = tpu.concatenate %20, %21 in 0 : vector<1x2x3xf32>, vector<7x2x3xf32> -> vector<8x2x3xf32>
    %23 = tpu.concatenate %22, %17, %19 in 2 : vector<8x2x3xf32>, vector<8x2x3xf32>, vector<8x2x3xf32> -> vector<8x2x9xf32>
    %24 = vector.shape_cast %23 : vector<8x2x9xf32> to vector<16x9xf32>
    %cst_9 = arith.constant dense<0.000000e+00> : vector<16x8xf32>
    %25 = tpu.matmul %24, %4, %cst_9 {dimension_numbers = #tpu.dot_dimension_numbers<[1], [0], [0], [1], [0, 0, 1, 1], [], []>} : vector<16x9xf32>, vector<9x8xf32>, vector<16x8xf32> -> vector<16x8xf32>
    %26 = vector.broadcast %5 : vector<1x8xf32> to vector<16x8xf32>
    %27 = arith.addf %25, %26 : vector<16x8xf32>
    %cst_10 = arith.constant 0.000000e+00 : f32
    %28 = vector.broadcast %cst_10 : f32 to vector<16x8xf32>
    %29 = arith.maximumf %27, %28 : vector<16x8xf32>
    %30 = vector.shape_cast %29 : vector<16x8xf32> to vector<8x2x8xf32>
    %31 = vector.shape_cast %30 : vector<8x2x8xf32> to vector<4x2x2x8xf32>
    %32 = vector.extract_strided_slice %31 {offsets = [0, 0, 0, 0], sizes = [4, 1, 2, 8], strides = [1, 1, 1, 1]} : vector<4x2x2x8xf32> to vector<4x1x2x8xf32>
    %33 = vector.shape_cast %32 : vector<4x1x2x8xf32> to vector<4x2x8xf32>
    %34 = vector.extract_strided_slice %31 {offsets = [0, 1, 0, 0], sizes = [4, 1, 2, 8], strides = [1, 1, 1, 1]} : vector<4x2x2x8xf32> to vector<4x1x2x8xf32>
    %35 = vector.shape_cast %34 : vector<4x1x2x8xf32> to vector<4x2x8xf32>
    %cst_11 = arith.constant 0.000000e+00 : f32
    %36 = vector.broadcast %cst_11 : f32 to vector<1x2x8xf32>
    %37 = vector.extract_strided_slice %35 {offsets = [0, 0, 0], sizes = [3, 2, 8], strides = [1, 1, 1]} : vector<4x2x8xf32> to vector<3x2x8xf32>
    %38 = tpu.concatenate %36, %37 in 0 : vector<1x2x8xf32>, vector<3x2x8xf32> -> vector<4x2x8xf32>
    %39 = tpu.concatenate %38, %33, %35 in 2 : vector<4x2x8xf32>, vector<4x2x8xf32>, vector<4x2x8xf32> -> vector<4x2x24xf32>
    %40 = vector.shape_cast %39 : vector<4x2x24xf32> to vector<8x24xf32>
    %cst_12 = arith.constant dense<0.000000e+00> : vector<8x8xf32>
    %41 = tpu.matmul %40, %6, %cst_12 {dimension_numbers = #tpu.dot_dimension_numbers<[1], [0], [0], [1], [0, 0, 1, 1], [], []>} : vector<8x24xf32>, vector<24x8xf32>, vector<8x8xf32> -> vector<8x8xf32>
    %42 = vector.broadcast %7 : vector<1x8xf32> to vector<8x8xf32>
    %43 = arith.addf %41, %42 : vector<8x8xf32>
    %cst_13 = arith.constant 0.000000e+00 : f32
    %44 = vector.broadcast %cst_13 : f32 to vector<8x8xf32>
    %45 = arith.maximumf %43, %44 : vector<8x8xf32>
    %46 = vector.shape_cast %45 : vector<8x8xf32> to vector<4x2x8xf32>
    %47 = vector.shape_cast %46 : vector<4x2x8xf32> to vector<2x2x2x8xf32>
    %48 = vector.extract_strided_slice %47 {offsets = [0, 0, 0, 0], sizes = [2, 1, 2, 8], strides = [1, 1, 1, 1]} : vector<2x2x2x8xf32> to vector<2x1x2x8xf32>
    %49 = vector.shape_cast %48 : vector<2x1x2x8xf32> to vector<2x2x8xf32>
    %50 = vector.extract_strided_slice %47 {offsets = [0, 1, 0, 0], sizes = [2, 1, 2, 8], strides = [1, 1, 1, 1]} : vector<2x2x2x8xf32> to vector<2x1x2x8xf32>
    %51 = vector.shape_cast %50 : vector<2x1x2x8xf32> to vector<2x2x8xf32>
    %cst_14 = arith.constant 0.000000e+00 : f32
    %52 = vector.broadcast %cst_14 : f32 to vector<1x2x8xf32>
    %53 = vector.extract_strided_slice %51 {offsets = [0, 0, 0], sizes = [1, 2, 8], strides = [1, 1, 1]} : vector<2x2x8xf32> to vector<1x2x8xf32>
    %54 = tpu.concatenate %52, %53 in 0 : vector<1x2x8xf32>, vector<1x2x8xf32> -> vector<2x2x8xf32>
    %55 = tpu.concatenate %54, %49, %51 in 2 : vector<2x2x8xf32>, vector<2x2x8xf32>, vector<2x2x8xf32> -> vector<2x2x24xf32>
    %56 = vector.shape_cast %55 : vector<2x2x24xf32> to vector<4x24xf32>
    %cst_15 = arith.constant dense<0.000000e+00> : vector<4x16xf32>
    %57 = tpu.matmul %56, %8, %cst_15 {dimension_numbers = #tpu.dot_dimension_numbers<[1], [0], [0], [1], [0, 0, 1, 1], [], []>} : vector<4x24xf32>, vector<24x16xf32>, vector<4x16xf32> -> vector<4x16xf32>
    %58 = vector.broadcast %9 : vector<1x16xf32> to vector<4x16xf32>
    %59 = arith.addf %57, %58 : vector<4x16xf32>
    %cst_16 = arith.constant 0.000000e+00 : f32
    %60 = vector.broadcast %cst_16 : f32 to vector<4x16xf32>
    %61 = arith.maximumf %59, %60 : vector<4x16xf32>
    %62 = vector.shape_cast %61 : vector<4x16xf32> to vector<2x2x16xf32>
    %cst_17 = arith.constant dense<0.000000e+00> : vector<2x16xf32>
    %63 = vector.multi_reduction <add>, %62, %cst_17 [0] : vector<2x2x16xf32> to vector<2x16xf32>
    %cst_18 = arith.constant 2.000000e+00 : f32
    %64 = vector.broadcast %cst_18 : f32 to vector<2x16xf32>
    %65 = arith.divf %63, %64 : vector<2x16xf32>
    %66 = vector.extract_strided_slice %2 {offsets = [0, 0, 0], sizes = [8, 2, 4], strides = [1, 1, 1]} : vector<8x2x5xf32> to vector<8x2x4xf32>
    %67 = vector.shape_cast %66 : vector<8x2x4xf32> to vector<16x4xf32>
    %68 = vector.extract_strided_slice %2 {offsets = [0, 0, 4], sizes = [8, 2, 1], strides = [1, 1, 1]} : vector<8x2x5xf32> to vector<8x2x1xf32>
    %69 = vector.shape_cast %68 : vector<8x2x1xf32> to vector<16x1xf32>
    %cst_19 = arith.constant dense<0.000000e+00> : vector<16x4xf32>
    %70 = tpu.matmul %67, %10, %cst_19 {dimension_numbers = #tpu.dot_dimension_numbers<[1], [0], [0], [1], [0, 0, 1, 1], [], []>} : vector<16x4xf32>, vector<4x4xf32>, vector<16x4xf32> -> vector<16x4xf32>
    %71 = vector.broadcast %11 : vector<1x4xf32> to vector<16x4xf32>
    %72 = arith.addf %70, %71 : vector<16x4xf32>
    %73 = vector.extract_strided_slice %12 {offsets = [0, 0], sizes = [4, 33], strides = [1, 1]} : vector<21x33xf32> to vector<4x33xf32>
    %cst_20 = arith.constant dense<0.000000e+00> : vector<16x33xf32>
    %74 = tpu.matmul %72, %73, %cst_20 {dimension_numbers = #tpu.dot_dimension_numbers<[1], [0], [0], [1], [0, 0, 1, 1], [], []>} : vector<16x4xf32>, vector<4x33xf32>, vector<16x33xf32> -> vector<16x33xf32>
    %75 = vector.extract_strided_slice %12 {offsets = [4, 0], sizes = [1, 33], strides = [1, 1]} : vector<21x33xf32> to vector<1x33xf32>
    %76 = vector.broadcast %69 : vector<16x1xf32> to vector<16x33xf32>
    %77 = vector.broadcast %75 : vector<1x33xf32> to vector<16x33xf32>
    %78 = arith.mulf %76, %77 : vector<16x33xf32>
    %79 = arith.addf %74, %78 : vector<16x33xf32>
    %80 = vector.broadcast %14 : vector<1x33xf32> to vector<16x33xf32>
    %81 = arith.addf %79, %80 : vector<16x33xf32>
    %82 = vector.extract_strided_slice %12 {offsets = [5, 0], sizes = [16, 33], strides = [1, 1]} : vector<21x33xf32> to vector<16x33xf32>
    %cst_21 = arith.constant dense<0.000000e+00> : vector<2x33xf32>
    %83 = tpu.matmul %65, %82, %cst_21 {dimension_numbers = #tpu.dot_dimension_numbers<[1], [0], [0], [1], [0, 0, 1, 1], [], []>} : vector<2x16xf32>, vector<16x33xf32>, vector<2x33xf32> -> vector<2x33xf32>
    %84 = vector.shape_cast %81 : vector<16x33xf32> to vector<8x2x33xf32>
    %85 = vector.shape_cast %83 : vector<2x33xf32> to vector<1x2x33xf32>
    %86 = vector.broadcast %85 : vector<1x2x33xf32> to vector<8x2x33xf32>
    %87 = arith.addf %84, %86 : vector<8x2x33xf32>
    %cst_22 = arith.constant 0.000000e+00 : f32
    %88 = vector.broadcast %cst_22 : f32 to vector<2x32xf32>
    %89 = vector.extract_strided_slice %87 {offsets = [0, 0, 0], sizes = [1, 2, 33], strides = [1, 1, 1]} : vector<8x2x33xf32> to vector<1x2x33xf32>
    %90 = vector.shape_cast %89 : vector<1x2x33xf32> to vector<2x33xf32>
    %91 = vector.extract_strided_slice %90 {offsets = [0, 0], sizes = [2, 32], strides = [1, 1]} : vector<2x33xf32> to vector<2x32xf32>
    %92 = vector.extract_strided_slice %90 {offsets = [0, 32], sizes = [2, 1], strides = [1, 1]} : vector<2x33xf32> to vector<2x1xf32>
    %93 = arith.negf %92 : vector<2x1xf32>
    %94 = math.exp %93 : vector<2x1xf32>
    %cst_23 = arith.constant 1.000000e+00 : f32
    %95 = vector.broadcast %cst_23 : f32 to vector<2x1xf32>
    %96 = arith.addf %95, %94 : vector<2x1xf32>
    %97 = arith.divf %95, %96 : vector<2x1xf32>
    %98 = math.tanh %88 : vector<2x32xf32>
    %99 = vector.broadcast %97 : vector<2x1xf32> to vector<2x32xf32>
    %100 = arith.mulf %99, %98 : vector<2x32xf32>
    %cst_24 = arith.constant 1.000000e+00 : f32
    %101 = vector.broadcast %cst_24 : f32 to vector<2x1xf32>
    %102 = arith.subf %101, %97 : vector<2x1xf32>
    %103 = math.tanh %91 : vector<2x32xf32>
    %104 = vector.broadcast %102 : vector<2x1xf32> to vector<2x32xf32>
    %105 = arith.mulf %104, %103 : vector<2x32xf32>
    %106 = arith.addf %100, %105 : vector<2x32xf32>
    %107 = math.tanh %106 : vector<2x32xf32>
    %108 = vector.broadcast %97 : vector<2x1xf32> to vector<2x32xf32>
    %109 = arith.mulf %108, %107 : vector<2x32xf32>
    %110 = vector.extract_strided_slice %87 {offsets = [1, 0, 0], sizes = [1, 2, 33], strides = [1, 1, 1]} : vector<8x2x33xf32> to vector<1x2x33xf32>
    %111 = vector.shape_cast %110 : vector<1x2x33xf32> to vector<2x33xf32>
    %cst_25 = arith.constant dense<0.000000e+00> : vector<2x33xf32>
    %112 = tpu.matmul %109, %13, %cst_25 {dimension_numbers = #tpu.dot_dimension_numbers<[1], [0], [0], [1], [0, 0, 1, 1], [], []>} : vector<2x32xf32>, vector<32x33xf32>, vector<2x33xf32> -> vector<2x33xf32>
    %113 = arith.addf %111, %112 : vector<2x33xf32>
    %114 = vector.extract_strided_slice %113 {offsets = [0, 0], sizes = [2, 32], strides = [1, 1]} : vector<2x33xf32> to vector<2x32xf32>
    %115 = vector.extract_strided_slice %113 {offsets = [0, 32], sizes = [2, 1], strides = [1, 1]} : vector<2x33xf32> to vector<2x1xf32>
    %116 = arith.negf %115 : vector<2x1xf32>
    %117 = math.exp %116 : vector<2x1xf32>
    %cst_26 = arith.constant 1.000000e+00 : f32
    %118 = vector.broadcast %cst_26 : f32 to vector<2x1xf32>
    %119 = arith.addf %118, %117 : vector<2x1xf32>
    %120 = arith.divf %118, %119 : vector<2x1xf32>
    %121 = math.tanh %106 : vector<2x32xf32>
    %122 = vector.broadcast %120 : vector<2x1xf32> to vector<2x32xf32>
    %123 = arith.mulf %122, %121 : vector<2x32xf32>
    %cst_27 = arith.constant 1.000000e+00 : f32
    %124 = vector.broadcast %cst_27 : f32 to vector<2x1xf32>
    %125 = arith.subf %124, %120 : vector<2x1xf32>
    %126 = math.tanh %114 : vector<2x32xf32>
    %127 = vector.broadcast %125 : vector<2x1xf32> to vector<2x32xf32>
    %128 = arith.mulf %127, %126 : vector<2x32xf32>
    %129 = arith.addf %123, %128 : vector<2x32xf32>
    %130 = math.tanh %129 : vector<2x32xf32>
    %131 = vector.broadcast %120 : vector<2x1xf32> to vector<2x32xf32>
    %132 = arith.mulf %131, %130 : vector<2x32xf32>
    %133 = vector.extract_strided_slice %87 {offsets = [2, 0, 0], sizes = [1, 2, 33], strides = [1, 1, 1]} : vector<8x2x33xf32> to vector<1x2x33xf32>
    %134 = vector.shape_cast %133 : vector<1x2x33xf32> to vector<2x33xf32>
    %cst_28 = arith.constant dense<0.000000e+00> : vector<2x33xf32>
    %135 = tpu.matmul %132, %13, %cst_28 {dimension_numbers = #tpu.dot_dimension_numbers<[1], [0], [0], [1], [0, 0, 1, 1], [], []>} : vector<2x32xf32>, vector<32x33xf32>, vector<2x33xf32> -> vector<2x33xf32>
    %136 = arith.addf %134, %135 : vector<2x33xf32>
    %137 = vector.extract_strided_slice %136 {offsets = [0, 0], sizes = [2, 32], strides = [1, 1]} : vector<2x33xf32> to vector<2x32xf32>
    %138 = vector.extract_strided_slice %136 {offsets = [0, 32], sizes = [2, 1], strides = [1, 1]} : vector<2x33xf32> to vector<2x1xf32>
    %139 = arith.negf %138 : vector<2x1xf32>
    %140 = math.exp %139 : vector<2x1xf32>
    %cst_29 = arith.constant 1.000000e+00 : f32
    %141 = vector.broadcast %cst_29 : f32 to vector<2x1xf32>
    %142 = arith.addf %141, %140 : vector<2x1xf32>
    %143 = arith.divf %141, %142 : vector<2x1xf32>
    %144 = math.tanh %129 : vector<2x32xf32>
    %145 = vector.broadcast %143 : vector<2x1xf32> to vector<2x32xf32>
    %146 = arith.mulf %145, %144 : vector<2x32xf32>
    %cst_30 = arith.constant 1.000000e+00 : f32
    %147 = vector.broadcast %cst_30 : f32 to vector<2x1xf32>
    %148 = arith.subf %147, %143 : vector<2x1xf32>
    %149 = math.tanh %137 : vector<2x32xf32>
    %150 = vector.broadcast %148 : vector<2x1xf32> to vector<2x32xf32>
    %151 = arith.mulf %150, %149 : vector<2x32xf32>
    %152 = arith.addf %146, %151 : vector<2x32xf32>
    %153 = math.tanh %152 : vector<2x32xf32>
    %154 = vector.broadcast %143 : vector<2x1xf32> to vector<2x32xf32>
    %155 = arith.mulf %154, %153 : vector<2x32xf32>
    %156 = vector.extract_strided_slice %87 {offsets = [3, 0, 0], sizes = [1, 2, 33], strides = [1, 1, 1]} : vector<8x2x33xf32> to vector<1x2x33xf32>
    %157 = vector.shape_cast %156 : vector<1x2x33xf32> to vector<2x33xf32>
    %cst_31 = arith.constant dense<0.000000e+00> : vector<2x33xf32>
    %158 = tpu.matmul %155, %13, %cst_31 {dimension_numbers = #tpu.dot_dimension_numbers<[1], [0], [0], [1], [0, 0, 1, 1], [], []>} : vector<2x32xf32>, vector<32x33xf32>, vector<2x33xf32> -> vector<2x33xf32>
    %159 = arith.addf %157, %158 : vector<2x33xf32>
    %160 = vector.extract_strided_slice %159 {offsets = [0, 0], sizes = [2, 32], strides = [1, 1]} : vector<2x33xf32> to vector<2x32xf32>
    %161 = vector.extract_strided_slice %159 {offsets = [0, 32], sizes = [2, 1], strides = [1, 1]} : vector<2x33xf32> to vector<2x1xf32>
    %162 = arith.negf %161 : vector<2x1xf32>
    %163 = math.exp %162 : vector<2x1xf32>
    %cst_32 = arith.constant 1.000000e+00 : f32
    %164 = vector.broadcast %cst_32 : f32 to vector<2x1xf32>
    %165 = arith.addf %164, %163 : vector<2x1xf32>
    %166 = arith.divf %164, %165 : vector<2x1xf32>
    %167 = math.tanh %152 : vector<2x32xf32>
    %168 = vector.broadcast %166 : vector<2x1xf32> to vector<2x32xf32>
    %169 = arith.mulf %168, %167 : vector<2x32xf32>
    %cst_33 = arith.constant 1.000000e+00 : f32
    %170 = vector.broadcast %cst_33 : f32 to vector<2x1xf32>
    %171 = arith.subf %170, %166 : vector<2x1xf32>
    %172 = math.tanh %160 : vector<2x32xf32>
    %173 = vector.broadcast %171 : vector<2x1xf32> to vector<2x32xf32>
    %174 = arith.mulf %173, %172 : vector<2x32xf32>
    %175 = arith.addf %169, %174 : vector<2x32xf32>
    %176 = math.tanh %175 : vector<2x32xf32>
    %177 = vector.broadcast %166 : vector<2x1xf32> to vector<2x32xf32>
    %178 = arith.mulf %177, %176 : vector<2x32xf32>
    %179 = vector.extract_strided_slice %87 {offsets = [4, 0, 0], sizes = [1, 2, 33], strides = [1, 1, 1]} : vector<8x2x33xf32> to vector<1x2x33xf32>
    %180 = vector.shape_cast %179 : vector<1x2x33xf32> to vector<2x33xf32>
    %cst_34 = arith.constant dense<0.000000e+00> : vector<2x33xf32>
    %181 = tpu.matmul %178, %13, %cst_34 {dimension_numbers = #tpu.dot_dimension_numbers<[1], [0], [0], [1], [0, 0, 1, 1], [], []>} : vector<2x32xf32>, vector<32x33xf32>, vector<2x33xf32> -> vector<2x33xf32>
    %182 = arith.addf %180, %181 : vector<2x33xf32>
    %183 = vector.extract_strided_slice %182 {offsets = [0, 0], sizes = [2, 32], strides = [1, 1]} : vector<2x33xf32> to vector<2x32xf32>
    %184 = vector.extract_strided_slice %182 {offsets = [0, 32], sizes = [2, 1], strides = [1, 1]} : vector<2x33xf32> to vector<2x1xf32>
    %185 = arith.negf %184 : vector<2x1xf32>
    %186 = math.exp %185 : vector<2x1xf32>
    %cst_35 = arith.constant 1.000000e+00 : f32
    %187 = vector.broadcast %cst_35 : f32 to vector<2x1xf32>
    %188 = arith.addf %187, %186 : vector<2x1xf32>
    %189 = arith.divf %187, %188 : vector<2x1xf32>
    %190 = math.tanh %175 : vector<2x32xf32>
    %191 = vector.broadcast %189 : vector<2x1xf32> to vector<2x32xf32>
    %192 = arith.mulf %191, %190 : vector<2x32xf32>
    %cst_36 = arith.constant 1.000000e+00 : f32
    %193 = vector.broadcast %cst_36 : f32 to vector<2x1xf32>
    %194 = arith.subf %193, %189 : vector<2x1xf32>
    %195 = math.tanh %183 : vector<2x32xf32>
    %196 = vector.broadcast %194 : vector<2x1xf32> to vector<2x32xf32>
    %197 = arith.mulf %196, %195 : vector<2x32xf32>
    %198 = arith.addf %192, %197 : vector<2x32xf32>
    %199 = math.tanh %198 : vector<2x32xf32>
    %200 = vector.broadcast %189 : vector<2x1xf32> to vector<2x32xf32>
    %201 = arith.mulf %200, %199 : vector<2x32xf32>
    %202 = vector.extract_strided_slice %87 {offsets = [5, 0, 0], sizes = [1, 2, 33], strides = [1, 1, 1]} : vector<8x2x33xf32> to vector<1x2x33xf32>
    %203 = vector.shape_cast %202 : vector<1x2x33xf32> to vector<2x33xf32>
    %cst_37 = arith.constant dense<0.000000e+00> : vector<2x33xf32>
    %204 = tpu.matmul %201, %13, %cst_37 {dimension_numbers = #tpu.dot_dimension_numbers<[1], [0], [0], [1], [0, 0, 1, 1], [], []>} : vector<2x32xf32>, vector<32x33xf32>, vector<2x33xf32> -> vector<2x33xf32>
    %205 = arith.addf %203, %204 : vector<2x33xf32>
    %206 = vector.extract_strided_slice %205 {offsets = [0, 0], sizes = [2, 32], strides = [1, 1]} : vector<2x33xf32> to vector<2x32xf32>
    %207 = vector.extract_strided_slice %205 {offsets = [0, 32], sizes = [2, 1], strides = [1, 1]} : vector<2x33xf32> to vector<2x1xf32>
    %208 = arith.negf %207 : vector<2x1xf32>
    %209 = math.exp %208 : vector<2x1xf32>
    %cst_38 = arith.constant 1.000000e+00 : f32
    %210 = vector.broadcast %cst_38 : f32 to vector<2x1xf32>
    %211 = arith.addf %210, %209 : vector<2x1xf32>
    %212 = arith.divf %210, %211 : vector<2x1xf32>
    %213 = math.tanh %198 : vector<2x32xf32>
    %214 = vector.broadcast %212 : vector<2x1xf32> to vector<2x32xf32>
    %215 = arith.mulf %214, %213 : vector<2x32xf32>
    %cst_39 = arith.constant 1.000000e+00 : f32
    %216 = vector.broadcast %cst_39 : f32 to vector<2x1xf32>
    %217 = arith.subf %216, %212 : vector<2x1xf32>
    %218 = math.tanh %206 : vector<2x32xf32>
    %219 = vector.broadcast %217 : vector<2x1xf32> to vector<2x32xf32>
    %220 = arith.mulf %219, %218 : vector<2x32xf32>
    %221 = arith.addf %215, %220 : vector<2x32xf32>
    %222 = math.tanh %221 : vector<2x32xf32>
    %223 = vector.broadcast %212 : vector<2x1xf32> to vector<2x32xf32>
    %224 = arith.mulf %223, %222 : vector<2x32xf32>
    %225 = vector.extract_strided_slice %87 {offsets = [6, 0, 0], sizes = [1, 2, 33], strides = [1, 1, 1]} : vector<8x2x33xf32> to vector<1x2x33xf32>
    %226 = vector.shape_cast %225 : vector<1x2x33xf32> to vector<2x33xf32>
    %cst_40 = arith.constant dense<0.000000e+00> : vector<2x33xf32>
    %227 = tpu.matmul %224, %13, %cst_40 {dimension_numbers = #tpu.dot_dimension_numbers<[1], [0], [0], [1], [0, 0, 1, 1], [], []>} : vector<2x32xf32>, vector<32x33xf32>, vector<2x33xf32> -> vector<2x33xf32>
    %228 = arith.addf %226, %227 : vector<2x33xf32>
    %229 = vector.extract_strided_slice %228 {offsets = [0, 0], sizes = [2, 32], strides = [1, 1]} : vector<2x33xf32> to vector<2x32xf32>
    %230 = vector.extract_strided_slice %228 {offsets = [0, 32], sizes = [2, 1], strides = [1, 1]} : vector<2x33xf32> to vector<2x1xf32>
    %231 = arith.negf %230 : vector<2x1xf32>
    %232 = math.exp %231 : vector<2x1xf32>
    %cst_41 = arith.constant 1.000000e+00 : f32
    %233 = vector.broadcast %cst_41 : f32 to vector<2x1xf32>
    %234 = arith.addf %233, %232 : vector<2x1xf32>
    %235 = arith.divf %233, %234 : vector<2x1xf32>
    %236 = math.tanh %221 : vector<2x32xf32>
    %237 = vector.broadcast %235 : vector<2x1xf32> to vector<2x32xf32>
    %238 = arith.mulf %237, %236 : vector<2x32xf32>
    %cst_42 = arith.constant 1.000000e+00 : f32
    %239 = vector.broadcast %cst_42 : f32 to vector<2x1xf32>
    %240 = arith.subf %239, %235 : vector<2x1xf32>
    %241 = math.tanh %229 : vector<2x32xf32>
    %242 = vector.broadcast %240 : vector<2x1xf32> to vector<2x32xf32>
    %243 = arith.mulf %242, %241 : vector<2x32xf32>
    %244 = arith.addf %238, %243 : vector<2x32xf32>
    %245 = math.tanh %244 : vector<2x32xf32>
    %246 = vector.broadcast %235 : vector<2x1xf32> to vector<2x32xf32>
    %247 = arith.mulf %246, %245 : vector<2x32xf32>
    %248 = vector.extract_strided_slice %87 {offsets = [7, 0, 0], sizes = [1, 2, 33], strides = [1, 1, 1]} : vector<8x2x33xf32> to vector<1x2x33xf32>
    %249 = vector.shape_cast %248 : vector<1x2x33xf32> to vector<2x33xf32>
    %cst_43 = arith.constant dense<0.000000e+00> : vector<2x33xf32>
    %250 = tpu.matmul %247, %13, %cst_43 {dimension_numbers = #tpu.dot_dimension_numbers<[1], [0], [0], [1], [0, 0, 1, 1], [], []>} : vector<2x32xf32>, vector<32x33xf32>, vector<2x33xf32> -> vector<2x33xf32>
    %251 = arith.addf %249, %250 : vector<2x33xf32>
    %252 = vector.extract_strided_slice %251 {offsets = [0, 32], sizes = [2, 1], strides = [1, 1]} : vector<2x33xf32> to vector<2x1xf32>
    %253 = tpu.concatenate %92, %115, %138, %161, %184, %207, %230, %252 in 1 : vector<2x1xf32>, vector<2x1xf32>, vector<2x1xf32>, vector<2x1xf32>, vector<2x1xf32>, vector<2x1xf32>, vector<2x1xf32>, vector<2x1xf32> -> vector<2x8xf32>
    %c0_44 = arith.constant 0 : index
    %c0_45 = arith.constant 0 : index
    %254 = vector.load %arg4[%c0_44, %c0_45] : memref<2x8xf32, #tpu.memory_space<vmem>>, vector<2x8xf32>
    tpu.vector_store %arg4[%c0_44, %c0_45], %253 {strides = array<i32>} : memref<2x8xf32, #tpu.memory_space<vmem>>, vector<2x8xf32>,
    return
  }
}

</mosaic_0001>

<bundles_post_ra>
// kernel: regressor_forward.1
= control target key start
LH: loop header
LB: loop body
LE: loop exit
PB: predicated region body
PF: predicated region fallthrough
CT: control target
= control target key end

     0   :  { %s1371_s19 = smov 3   ;;  %s1372_s22 = smov 6   ;;  %s1769_s0 = inlined_call_operand.vmem [shape: f32[8,2,5], index: 0, kind: input, shape index: {}]   ;;  %s1770_s1 = inlined_call_operand.vmem [shape: f32[16,2,3], index: 1, kind: input, shape index: {}]   ;;  %s1771_s2 = inlined_call_operand.vmem [shape: f32[60,16], index: 2, kind: input, shape index: {}]   ;;  %s1772_s3 = inlined_call_operand.vmem [shape: f32[59,33], index: 3, kind: input, shape index: {}]   ;;  %s1773_s4 = inlined_call_operand.hbm [shape: f32[2,8], index: 4, kind: output, shape index: {}]  }
   0x1   :  { %v46_v0 = vld [vmem:[%s1770_s1 + $0x8] sm:$0x3]  ;;  %v42_v1 = vld [vmem:[%s1770_s1] sm:$0x3]  ;;  %v43_v2 = vld [vmem:[%s1770_s1 + $0x2] sm:$0x3] }
   0x2   :  { %70 = vrot.lane.b32.xlu1 %v46_v0, %s1371_s19  ;;  %66 = vrot.lane.b32.xlu0 %v42_v1, %s1371_s19 }
   0x3   :  { %98 = vrot.lane.b32.xlu2 %v43_v2, %s1372_s22 }
   0x4   :  { %9 = vsyncpa [#allocation3], 0  ;;  %v48_v3 = vld [vmem:[%s1770_s1 + $0xc] sm:$0x3]  ;;  %v44_v4 = vld [vmem:[%s1770_s1 + $0x4] sm:$0x3] }
   0x5   :  { %v45_v5 = vld [vmem:[%s1770_s1 + $0x6] sm:$0x3]  ;;  %v49_v6 = vld [vmem:[%s1770_s1 + $0xe] sm:$0x3]  ;;  %v47_v7 = vld [vmem:[%s1770_s1 + $0xa] sm:$0x3] }
   0x6   :  { %v50_v8 = vld [vmem:[%s1770_s1 + $0x10] sm:$0x3]  ;;  %v54_v9 = vld [vmem:[%s1770_s1 + $0x18] sm:$0x3]  ;;  %v52_v10 = vld [vmem:[%s1770_s1 + $0x14] sm:$0x3] }
   0x7   :  { %v56_v11 = vld [vmem:[%s1770_s1 + $0x1c] sm:$0x3]  ;;  %v53_v12 = vld [vmem:[%s1770_s1 + $0x16] sm:$0x3]  ;;  %v51_v13 = vld [vmem:[%s1770_s1 + $0x12] sm:$0x3] }
   0x8   :  { %v55_v14 = vld [vmem:[%s1770_s1 + $0x1a] sm:$0x3]  ;;  %v57_v15 = vld [vmem:[%s1770_s1 + $0x1e] sm:$0x3]  ;;  %v1464_v17 = vld [vmem:[%s1771_s2 + $0x8] sm:$0xff]  ;;  %vm171_vm0 = vcmask 1040384  }
   0x9   :  { %1232 = vmatpush.msk.msra.mxu0 %vm171_vm0, %v1464_v17  ;;  %v18_v19 = vld [vmem:[%s1771_s2] sm:$0xff]  ;;  %vm122_vm1 = vcmask 23552   ;;  %vm131_vm2 = vcmask 48128   ;;  %vm166_vm3 = vcmask 72704   ;;  %v140_v52 = vperm.slane %v1464_v17, 1  ;;  %s1373_s1 = smov 8  }
   0xa   :  { %72 = vrot.lane.b32.xlu1 %v48_v3, %s1371_s19  ;;  %68 = vrot.lane.b32.xlu0 %v44_v4, %s1371_s19  ;;  %vm258_vm4 = vcmask 130048   ;;  %vm253_vm5 = vcmask 64512   ;;  %vm279_vm6 = vcmask 1045504   ;;  %vm290_vm7 = vcmask 195584   ;;  %s1381_s17 = smov 102   ;;  %s1382_s18 = smov 97  }
   0xb   :  { %100 = vrot.lane.b32.xlu2 %v45_v5, %s1372_s22  ;;  %190 = vmatpush.msra.mxu0 %v18_v19  ;;  %v20_v19 = vld [vmem:[%s1771_s2 + $0x10] sm:$0xff]  ;;  %vm355_vm8 = vcmask 1044480   ;;  %vm435_vm9 = vcmask 1043456   ;;  %vm430_vm10 = vcmask 31744   ;;  %vm543_vm11 = vcmask 1042432   ;;  %s1383_s20 = smov 98  }
   0xc   :  { %vm392_vm12 = vcmask 123904   ;;  %s1384_s21 = smov 100   ;;  %s1385_s23 = smov 101  }
   0xd   :  { %s1386_s24 = smov 103  }
  0x12   :  { %104 = vrot.lane.b32.xlu1 %v49_v6, %s1372_s22  ;;  %102 = vrot.lane.b32.xlu0 %v47_v7, %s1372_s22 }
  0x13   :  { %74 = vrot.lane.b32.xlu2 %v50_v8, %s1371_s19 }
  0x1a   :  { %78 = vrot.lane.b32.xlu1 %v54_v9, %s1371_s19  ;;  %76 = vrot.lane.b32.xlu0 %v52_v10, %s1371_s19 }
  0x1b   :  { %80 = vrot.lane.b32.xlu2 %v56_v11, %s1371_s19  ;;  %s1387_s19 = smov [#allocation2]  }
  0x1c   :  { %s1221_s25 = sshll.u32 %s1387_s19, 4  ;;  %s1222_s25 = int_to_ptr.vmem [resolvable:$true] %s1221_s25 }
  0x22   :  { %108 = vrot.lane.b32.xlu1 %v53_v12, %s1372_s22  ;;  %106 = vrot.lane.b32.xlu0 %v51_v13, %s1372_s22 }
  0x23   :  { %110 = vrot.lane.b32.xlu2 %v55_v14, %s1372_s22 }
  0x2a   :  { %112 = vrot.lane.b32.xlu0 %v57_v15, %s1372_s22  ;;  %s1374_s22 = smov 16   ;;  %v1511_v15 = vld [vmem:[%s1771_s2 + $0x20] sm:$0xff] }
  0x5d   :  { %v99_v16 = vpop.permute.xlu2 %98 }
  0x65   :  { %v101_v18 = vpop.permute.xlu2 %100 }
  0x6d   :  { %v75_v24 = vpop.permute.xlu2 %74 }
  0x6e   :  { %v127_v42 = vsel %vm122_vm1, %v49_v6, %v75_v24 }
  0x74   :  { %v71_v20 = vpop.permute.xlu1 %70  ;;  %v67_v21 = vpop.permute.xlu0 %66 }
  0x75   :  { %v123_v22 = vsel %vm122_vm1, 0.0, %v67_v21  ;;  %v81_v29 = vpop.permute.xlu2 %80  ;;  %v125_v31 = vsel %vm122_vm1, %v45_v5, %v71_v20  ;;  %v280_v20 = vrot.slane %v1464_v17, 2 }
  0x76   :  { %v132_v23 = vsel %vm131_vm2, %v123_v22, %v99_v16  ;;  %v130_v48 = vsel %vm122_vm1, %v55_v14, %v81_v29  ;;  %v21_v14 = vld [vmem:[%s1771_s2 + $0x18] sm:$0xff]  ;;  %v281_v22 = vrot.slane %v20_v19, 2 }
  0x77   :  { %149 = vst [vmem:[#allocation1] ss:$4 sm:$0xff] %v132_v23  ;;  %v283_v16 = vrot.slane %v21_v14, 2  ;;  %v27_v14 = vld [vmem:[%s1772_s3 + $0x8] sm:$0xff] }
  0x78   :  { %v282_v24 = vsel %vm279_vm6, %v280_v20, %v281_v22  ;;  %v1590_v20 = vperm.slane %v27_v14, 1 }
  0x79   :  { %v284_v23 = vsel %vm279_vm6, %v281_v22, %v283_v16  ;;  %v1376_v22 = vmov 2.0  }
  0x7a   :  { %1287 = vrcp.f32 %v1376_v22 }
  0x7c   :  { %v73_v25 = vpop.permute.xlu1 %72  ;;  %v69_v26 = vpop.permute.xlu0 %68 }
  0x7d   :  { %v124_v27 = vsel %vm122_vm1, %v43_v2, %v69_v26  ;;  %v126_v30 = vsel %vm122_vm1, %v47_v7, %v73_v25  ;;  %v111_v36 = vpop.permute.xlu2 %110 }
  0x7e   :  { %v133_v28 = vsel %vm131_vm2, %v124_v27, %v101_v18  ;;  %v285_v18 = vrot.slane %v1511_v15, 2 }
  0x7f   :  { %151 = vst [vmem:[#allocation1 + $0x1] ss:$4 sm:$0xff] %v133_v28 }
  0x80   :  { %v286_v21 = vsel %vm279_vm6, %v283_v16, %v285_v18  ;;  %v610_v18 = vrot.slane %v27_v14, 2 }
  0x81   :  { %306 = vmatpush.msra.mxu1 %v286_v21 }
  0x83   :  { %307 = vmatpush.msra.mxu1 %v284_v23 }
  0x84   :  { %v105_v32 = vpop.permute.xlu1 %104  ;;  %v103_v33 = vpop.permute.xlu0 %102 }
  0x85   :  { %v135_v34 = vsel %vm131_vm2, %v126_v30, %v105_v32  ;;  %v134_v35 = vsel %vm131_vm2, %v125_v31, %v103_v33  ;;  %308 = vmatpush.msra.mxu1 %v282_v24  ;;  %v1377_v24 = vmov 269488144  }
  0x86   :  { %155 = vst [vmem:[#allocation1 + $0x3] ss:$4 sm:$0xff] %v135_v34 }
  0x87   :  { %153 = vst [vmem:[#allocation1 + $0x2] ss:$4 sm:$0xff] %v134_v35 }
  0x8c   :  { %v79_v37 = vpop.permute.xlu1 %78  ;;  %v77_v38 = vpop.permute.xlu0 %76 }
  0x8d   :  { %v129_v39 = vsel %vm122_vm1, %v53_v12, %v79_v37  ;;  %v128_v43 = vsel %vm122_vm1, %v51_v13, %v77_v38 }
  0x8e   :  { %v164_v40 = vld.sshfl [vmem:[#allocation1] sm:$0xff pattern:$0x73625140]  ;;  %v138_v41 = vsel %vm131_vm2, %v129_v39, %v111_v36  ;;  %v263_v36 = vperm.slane %v1511_v15, 2 }
  0x8f   :  { %1233 = vmatmul.msk.f32.vlgmr.msra.gmra.mxu0 %vm166_vm3, %v164_v40  ;;  %161 = vst [vmem:[#allocation1 + $0x22] ss:$4 sm:$0xff] %v138_v41 }
  0x94   :  { %v109_v44 = vpop.permute.xlu1 %108  ;;  %v107_v45 = vpop.permute.xlu0 %106 }
  0x95   :  { %v137_v46 = vsel %vm131_vm2, %v128_v43, %v109_v44  ;;  %v136_v47 = vsel %vm131_vm2, %v127_v42, %v107_v45 }
  0x96   :  { %159 = vst [vmem:[#allocation1 + $0x21] ss:$4 sm:$0xff] %v137_v46 }
  0x97   :  { %157 = vst [vmem:[#allocation1 + $0x20] ss:$4 sm:$0xff] %v136_v47  ;;  %v24_v47 = vld [vmem:[%s1771_s2 + $0x30] sm:$0xff] }
  0x9c   :  { %v113_v49 = vpop.permute.xlu0 %112 }
  0x9d   :  { %v139_v50 = vsel %vm131_vm2, %v130_v48, %v113_v49  ;;  %v1539_v48 = vld [vmem:[%s1771_s2 + $0x38] sm:$0xf]  ;;  %v359_v49 = vrot.slane %v24_v47, 3 }
  0x9e   :  { %163 = vst [vmem:[#allocation1 + $0x23] ss:$4 sm:$0xff] %v139_v50  ;;  %v361_v50 = vrot.slane %v1539_v48, 3 }
  0xa5   :  { %v165_v51 = vld.sshfl [vmem:[#allocation1 + $0x20] sm:$0xff pattern:$0x73625140] }
  0xa6   :  { %1234 = vmatmul.msk.f32.gmra.mxu0 %vm166_vm3, %v165_v51  ;;  %v23_v51 = vld [vmem:[%s1771_s2 + $0x28] sm:$0xff] }
 0x10c   :  { %v192_v53 = vpop.f32.mrf.mxu0 }
 0x10d   :  { %v193_v54 = vadd.f32 %v192_v53, %v140_v52  ;;  %v357_v53 = vrot.slane %v23_v51, 3 }
 0x10f   :  { %v1489_v55 = vmax.f32 %v193_v54, 0.0  ;;  %v360_v54 = vsel %vm355_vm8, %v357_v53, %v359_v49 }
 0x111   :  { %v203_v56 = vrot.slane %v1489_v55, 4  ;;  %211 = vst [vmem:[#allocation1] ss:$4 sm:$0xff] %v1489_v55  ;;  %v202_v63 = vrot.slane %v1489_v55, 2  ;;  %v204_v1 = vrot.slane %v1489_v55, 6  ;;  %v356_v55 = vrot.slane %v1511_v15, 3 }
 0x112   :  { %v545_v15 = vrot.slane %v27_v14, 5 }
 0x113   :  { %214 = vst [vmem:[#allocation1 + $0x20] ss:$4 sm:$0xff] %v203_v56  ;;  %v358_v56 = vsel %vm355_vm8, %v356_v55, %v357_v53 }
 0x118   :  { %v212_v57 = vld.sshfl [vmem:[#allocation1] sm:$0xff pattern:$0x73625140] }
 0x119   :  { %220 = vrot.lane.b32.xlu1 %v212_v57, %s1373_s1  ;;  %v1549_v57 = vld [vmem:[%s1772_s3] sm:$0xff] }
 0x11a   :  { %v215_v58 = vld.sshfl [vmem:[#allocation1 + $0x20] sm:$0xff pattern:$0x73625140]  ;;  %1237 = vmatpush.msk.msra.mxu3 %vm435_vm9, %v1549_v57  ;;  %v404_v55 = vperm.slane %v1549_v57, 4 }
 0x11b   :  { %222 = vrot.lane.b32.xlu2 %v215_v58, %s1373_s1 }
 0x123   :  { %v195_v59 = vpop.f32.mrf.mxu0 }
 0x124   :  { %v196_v60 = vadd.f32 %v195_v59, %v140_v52  ;;  %v362_v52 = vsel %vm355_vm8, %v359_v49, %v361_v50  ;;  %v34_v59 = vld [vmem:[%s1769_s0] sm:$0x3] }
 0x125   :  { %381 = vmatpush.msra.mxu2 %v362_v52 }
 0x126   :  { %v199_v61 = vmax.f32 %v196_v60, 0.0  ;;  %v36_v60 = vld [vmem:[%s1769_s0 + $0x4] sm:$0x3] }
 0x127   :  { %382 = vmatpush.msra.mxu2 %v360_v54 }
 0x128   :  { %v206_v62 = vrot.slane %v199_v61, 4  ;;  %216 = vst [vmem:[#allocation1] ss:$4 sm:$0xff] %v199_v61  ;;  %v205_v3 = vrot.slane %v199_v61, 2  ;;  %v207_v5 = vrot.slane %v199_v61, 6  ;;  %v1375_v61 = vmov 4  }
 0x129   :  { %383 = vmatpush.msra.mxu2 %v358_v56  ;;  %1275 = vset.pattern.permute.xlu1 %v1375_v61 }
 0x12a   :  { %218 = vst [vmem:[#allocation1 + $0x20] ss:$4 sm:$0xff] %v206_v62  ;;  %1277 = vset.pattern.permute.xlu0 %v1375_v61  ;;  %1276 = vset.pattern.permute.xlu2 %v1375_v61 }
 0x12f   :  { %v217_v0 = vld.sshfl [vmem:[#allocation1] sm:$0xff pattern:$0x73625140] }
 0x130   :  { %232 = vst [vmem:[#allocation1] ss:$4 sm:$0xff] %v202_v63  ;;  %224 = vrot.lane.b32.xlu0 %v217_v0, %s1373_s1 }
 0x131   :  { %v219_v2 = vld.sshfl [vmem:[#allocation1 + $0x20] sm:$0xff pattern:$0x73625140] }
 0x132   :  { %235 = vst [vmem:[#allocation1 + $0x20] ss:$4 sm:$0xff] %v204_v1  ;;  %226 = vrot.lane.b32.xlu1 %v219_v2, %s1373_s1 }
 0x137   :  { %v233_v4 = vld.sshfl [vmem:[#allocation1] sm:$0xff pattern:$0x73625140] }
 0x138   :  { %237 = vst [vmem:[#allocation1] ss:$4 sm:$0xff] %v205_v3  ;;  %241 = vrot.lane.b32.xlu2 %v233_v4, %s1374_s22 }
 0x139   :  { %v236_v6 = vld.sshfl [vmem:[#allocation1 + $0x20] sm:$0xff pattern:$0x73625140] }
 0x13a   :  { %239 = vst [vmem:[#allocation1 + $0x20] ss:$4 sm:$0xff] %v207_v5  ;;  %243 = vrot.lane.b32.xlu0 %v236_v6, %s1374_s22 }
 0x13f   :  { %v238_v7 = vld.sshfl [vmem:[#allocation1] sm:$0xff pattern:$0x73625140] }
 0x140   :  { %245 = vrot.lane.b32.xlu1 %v238_v7, %s1374_s22 }
 0x141   :  { %v240_v8 = vld.sshfl [vmem:[#allocation1 + $0x20] sm:$0xff pattern:$0x73625140] }
 0x142   :  { %247 = vrot.lane.b32.xlu2 %v240_v8, %s1374_s22 }
 0x175   :  { %v223_v9 = vpop.permute.xlu2 %222 }
 0x176   :  { %v255_v17 = vsel %vm253_vm5, %v202_v63, %v223_v9  ;;  %v544_v9 = vrot.slane %v1549_v57, 5 }
 0x178   :  { %v546_v19 = vsel %vm543_vm11, %v544_v9, %v545_v15 }
 0x179   :  { %1240 = vmatpush.msk.msrb.mxu1 %vm435_vm9, %v546_v19 }
 0x18b   :  { %v221_v10 = vpop.permute.xlu1 %220 }
 0x18c   :  { %v254_v11 = vsel %vm253_vm5, 0.0, %v221_v10  ;;  %v28_v10 = vld [vmem:[%s1772_s3 + $0x10] sm:$0xff] }
 0x192   :  { %v242_v12 = vpop.permute.xlu2 %241 }
 0x193   :  { %v259_v13 = vsel %vm258_vm4, %v254_v11, %v242_v12  ;;  %v1581_v11 = vld [vmem:[%s1772_s3 + $0x18] sm:$0xff]  ;;  %v611_v12 = vrot.slane %v28_v10, 2 }
 0x194   :  { %268 = vst [vmem:[#allocation1] ss:$4 sm:$0xff] %v259_v13  ;;  %v613_v13 = vrot.slane %v1581_v11, 2 }
 0x195   :  { %v612_v21 = vsel %vm279_vm6, %v610_v18, %v611_v12 }
 0x196   :  { %v614_v16 = vsel %vm279_vm6, %v611_v12, %v613_v13 }
 0x197   :  { %634 = vmatpush.msrb.mxu2 %v614_v16 }
 0x199   :  { %635 = vmatpush.msrb.mxu2 %v612_v21 }
 0x19c   :  { %v248_v27 = vpop.permute.xlu2 %247 }
 0x1a2   :  { %v225_v25 = vpop.permute.xlu0 %224 }
 0x1a3   :  { %v256_v32 = vsel %vm253_vm5, %v204_v1, %v225_v25  ;;  %v35_v1 = vld [vmem:[%s1769_s0 + $0x2] sm:$0x3]  ;;  %v467_v25 = vunpack.c.l.s4 %v1377_v24 }
 0x1a4   :  { %v227_v26 = vpop.permute.xlu1 %226 }
 0x1a5   :  { %v257_v28 = vsel %vm253_vm5, %v205_v3, %v227_v26  ;;  %v37_v3 = vld [vmem:[%s1769_s0 + $0x6] sm:$0x3] }
 0x1a6   :  { %v262_v29 = vsel %vm258_vm4, %v257_v28, %v248_v27  ;;  %v1594_v28 = vunpack.c.0.s8 %v467_v25 }
 0x1a7   :  { %274 = vst [vmem:[#allocation1 + $0x3] ss:$4 sm:$0xff] %v262_v29  ;;  %v529_v29 = vrot.slane %v1590_v20, 4 }
 0x1ac   :  { %v244_v30 = vpop.permute.xlu0 %243 }
 0x1ad   :  { %v260_v31 = vsel %vm258_vm4, %v255_v17, %v244_v30  ;;  %v528_v17 = vrot.slane %v1590_v20, 2 }
 0x1ae   :  { %270 = vst [vmem:[#allocation1 + $0x1] ss:$4 sm:$0xff] %v260_v31 }
 0x1b2   :  { %v246_v33 = vpop.permute.xlu1 %245 }
 0x1b3   :  { %v261_v34 = vsel %vm258_vm4, %v256_v32, %v246_v33  ;;  %v1288_v33 = vpop.eup %1287 }
 0x1b4   :  { %272 = vst [vmem:[#allocation1 + $0x2] ss:$4 sm:$0xff] %v261_v34  ;;  %vm401_vm13 = vweird.f32 %v1288_v33 }
 0x1bb   :  { %v275_v35 = vld.sshfl [vmem:[#allocation1] sm:$0xff pattern:$0x73625140] }
 0x1bc   :  { %1235 = vmatmul.msk.f32.vlgmr.msra.gmra.mxu1 %vm290_vm7, %v275_v35  ;;  %v530_v35 = vrot.slane %v1590_v20, 6 }
 0x239   :  { %v310_v37 = vpop.f32.mrf.mxu1 }
 0x23a   :  { %v311_v38 = vadd.f32 %v310_v37, %v263_v36 }
 0x23c   :  { %v313_v39 = vmax.f32 %v311_v38, 0.0 }
 0x23e   :  { %v317_v40 = vrot.slane %v313_v39, 4  ;;  %319 = vst [vmem:[#allocation1] ss:$4 sm:$0xff] %v313_v39  ;;  %v315_v41 = vrot.slane %v313_v39, 2  ;;  %v318_v43 = vrot.slane %v313_v39, 6  ;;  %v397_v39 = vmul.f32 2.0, %v1288_v33 }
 0x240   :  { %322 = vst [vmem:[#allocation1 + $0x20] ss:$4 sm:$0xff] %v317_v40 }
 0x245   :  { %v320_v42 = vld.sshfl [vmem:[#allocation1] sm:$0xff pattern:$0x73625140] }
 0x246   :  { %330 = vst [vmem:[#allocation1] ss:$4 sm:$0xff] %v315_v41  ;;  %324 = vrot.lane.b32.xlu0 %v320_v42, %s1373_s1  ;;  %v398_v42 = vsub.f32 1.0, %v397_v39 }
 0x247   :  { %v323_v44 = vld.sshfl [vmem:[#allocation1 + $0x20] sm:$0xff pattern:$0x73625140] }
 0x248   :  { %326 = vrot.lane.b32.xlu1 %v323_v44, %s1373_s1  ;;  %333 = vst [vmem:[#allocation1 + $0x20] ss:$4 sm:$0xff] %v318_v43  ;;  %v345_v43 = vperm.slane %v1539_v48, 3  ;;  %v399_v44 = vmul.f32 %v1288_v33, %v398_v42  ;;  %v32_v48 = vld [vmem:[%s1772_s3 + $0x30] sm:$0xff]  ;;  %s1223_s1 = sshll.u32 %s1773_s4, 4  ;;  %s1224_s1 = int_to_ptr.hbm [resolvable:$true] %s1223_s1 }
 0x24a   :  { %v400_v49 = vadd.f32 %v1288_v33, %v399_v44 }
 0x24c   :  { %v402_v53 = vsel %vm401_vm13, %v1288_v33, %v400_v49  ;;  %v1669_v33 = vld [vmem:[%s1769_s0 + $0xe] sm:$0x3] }
 0x24d   :  { %v331_v45 = vld.sshfl [vmem:[#allocation1] sm:$0xff pattern:$0x73625140] }
 0x24e   :  { %335 = vrot.lane.b32.xlu2 %v331_v45, %s1374_s22 }
 0x24f   :  { %v334_v46 = vld.sshfl [vmem:[#allocation1 + $0x20] sm:$0xff pattern:$0x73625140] }
 0x250   :  { %337 = vrot.lane.b32.xlu0 %v334_v46, %s1374_s22  ;;  %463 = vperm.xlu1 %1275, %v34_v59   ;;  %427 = vst [vmem:[#allocation1 + $0x23] ss:$4 sm:$0xff] %v1669_v33 }
 0x256   :  { %471 = vperm.xlu2 %1276, %v35_v1  }
 0x258   :  { %479 = vperm.xlu0 %1277, %v36_v60   ;;  %487 = vperm.xlu1 %1275, %v37_v3  }
 0x2a8   :  { %v336_v62 = vpop.permute.xlu2 %335 }
 0x2b0   :  { %v472_v27 = vpop.permute.xlu2 %471 }
 0x2b1   :  { %v477_v32 = vperm.slane %v472_v27, %v1594_v28  ;;  %v1651_v27 = vld [vmem:[%s1769_s0 + $0x8] sm:$0x3] }
 0x2b2   :  { %421 = vst [vmem:[#allocation1 + $0x20] ss:$4 sm:$0xff] %v1651_v27 }
 0x2b3   :  { %v535_v37 = vmul.f32 %v528_v17, %v477_v32  ;;  %v30_v32 = vld [vmem:[%s1772_s3 + $0x20] sm:$0xff] }
 0x2b8   :  { %v325_v58 = vpop.permute.xlu0 %324 }
 0x2b9   :  { %v341_v63 = vsel %vm253_vm5, 0.0, %v325_v58 }
 0x2ba   :  { %v343_v0 = vsel %vm258_vm4, %v341_v63, %v336_v62  ;;  %v327_v2 = vpop.permute.xlu1 %326  ;;  %v714_v62 = vrot.slane %v32_v48, 2 }
 0x2bb   :  { %348 = vst [vmem:[#allocation1] ss:$4 sm:$0xff] %v343_v0  ;;  %v342_v4 = vsel %vm253_vm5, %v315_v41, %v327_v2 }
 0x2c2   :  { %v338_v5 = vpop.permute.xlu0 %337  ;;  %v464_v23 = vpop.permute.xlu1 %463 }
 0x2c3   :  { %v344_v6 = vsel %vm258_vm4, %v342_v4, %v338_v5  ;;  %v469_v30 = vperm.slane %v464_v23, %v1594_v28 }
 0x2c4   :  { %350 = vst [vmem:[#allocation1 + $0x1] ss:$4 sm:$0xff] %v344_v6 }
 0x2c5   :  { %v534_v34 = vmul.f32 %v1590_v20, %v469_v30  ;;  %v1656_v30 = vld [vmem:[%s1769_s0 + $0xa] sm:$0x3] }
 0x2c6   :  { %423 = vst [vmem:[#allocation1 + $0x21] ss:$4 sm:$0xff] %v1656_v30 }
 0x2ca   :  { %v480_v26 = vpop.permute.xlu0 %479  ;;  %v488_v38 = vpop.permute.xlu1 %487 }
 0x2cb   :  { %v351_v7 = vld.sshfl [vmem:[#allocation1] sm:$0xff pattern:$0x73625140]  ;;  %v485_v31 = vperm.slane %v480_v26, %v1594_v28  ;;  %v493_v40 = vperm.slane %v488_v38, %v1594_v28 }
 0x2cc   :  { %415 = vst [vmem:[#allocation1 + $0x1] ss:$4 sm:$0xff] %v35_v1  ;;  %1236 = vmatmul.msk.f32.vlgmr.msra.gmra.mxu2 %vm290_vm7, %v351_v7  ;;  %v1378_v1 = vmov 32  }
 0x2cd   :  { %413 = vst [vmem:[#allocation1] ss:$4 sm:$0xff] %v34_v59  ;;  %v536_v36 = vmul.f32 %v529_v29, %v485_v31  ;;  %v537_v41 = vmul.f32 %v530_v35, %v493_v40  ;;  %1278 = vset.pattern.permute.xlu2 %v1378_v1  ;;  %1279 = vset.pattern.permute.xlu1 %v1378_v1  ;;  %v1661_v31 = vld [vmem:[%s1769_s0 + $0xc] sm:$0x3]  ;;  %s1379_s0 = smov 96  }
 0x2ce   :  { %417 = vst [vmem:[#allocation1 + $0x2] ss:$4 sm:$0xff] %v36_v60  ;;  %v1622_v60 = vld [vmem:[%s1772_s3 + $0x38] sm:$0x7]  ;;  %1280 = vset.pattern.permute.xlu0 %v1378_v1 }
 0x2cf   :  { %419 = vst [vmem:[#allocation1 + $0x3] ss:$4 sm:$0xff] %v37_v3  ;;  %v716_v63 = vrot.slane %v1622_v60, 2  ;;  %v605_v2 = vperm.slane %v1622_v60, 2 }
 0x2d0   :  { %425 = vst [vmem:[#allocation1 + $0x22] ss:$4 sm:$0xff] %v1661_v31 }
 0x2d1   :  { %v1626_v0 = vsel %vm279_vm6, %v714_v62, %v716_v63 }
 0x2d2   :  { %738 = vmatpush.msrb.mxu3 %v1626_v0  ;;  %806 = vmatpush.msrb.mxu0 %v1626_v0 }
 0x2d3   :  { %874 = vmatpush.msra.mxu2 %v1626_v0  ;;  %1078 = vmatpush.msra.mxu1 %v1626_v0 }
 0x2d6   :  { %v428_v8 = vld.sshfl [vmem:[#allocation1] sm:$0xff pattern:$0x73625140] }
 0x2d7   :  { %1238 = vmatmul.msk.f32.vlgmr.msra.gmra.mxu3 %vm430_vm10, %v428_v8  ;;  %555 = vst [vmem:[#allocation1] ss:$4 sm:$0xff] %v534_v34  ;;  %v710_v34 = vrot.slane %v30_v32, 2 }
 0x2d8   :  { %559 = vst [vmem:[#allocation1 + $0x2] ss:$4 sm:$0xff] %v536_v36  ;;  %v31_v36 = vld [vmem:[%s1772_s3 + $0x28] sm:$0xff]  ;;  %s1380_s3 = smov 99  }
 0x2d9   :  { %557 = vst [vmem:[#allocation1 + $0x1] ss:$4 sm:$0xff] %v535_v37  ;;  %v712_v37 = vrot.slane %v31_v36, 2  ;;  %v711_v40 = vsel %vm279_vm6, %v613_v13, %v710_v34 }
 0x2da   :  { %561 = vst [vmem:[#allocation1 + $0x3] ss:$4 sm:$0xff] %v537_v41  ;;  %v429_v41 = vld.sshfl [vmem:[#allocation1 + $0x20] sm:$0xff pattern:$0x73625140] }
 0x2db   :  { %v715_v38 = vsel %vm279_vm6, %v712_v37, %v714_v62  ;;  %v713_v39 = vsel %vm279_vm6, %v710_v34, %v712_v37 }
 0x2dc   :  { %739 = vmatpush.msrb.mxu3 %v715_v38  ;;  %807 = vmatpush.msrb.mxu0 %v715_v38 }
 0x2dd   :  { %875 = vmatpush.msra.mxu2 %v715_v38  ;;  %1079 = vmatpush.msra.mxu1 %v715_v38 }
 0x2de   :  { %740 = vmatpush.msrb.mxu3 %v713_v39  ;;  %808 = vmatpush.msrb.mxu0 %v713_v39 }
 0x2df   :  { %1239 = vmatmul.msk.f32.gmra.mxu3 %vm430_vm10, %v429_v41  ;;  %876 = vmatpush.msra.mxu2 %v713_v39 }
 0x2e0   :  { %741 = vmatpush.msrb.mxu3 %v711_v40  ;;  %809 = vmatpush.msrb.mxu0 %v711_v40 }
 0x2e1   :  { %v570_v3 = vld.sshfl [vmem:[#allocation1] sm:$0xff pattern:$0x73625140]  ;;  %877 = vmatpush.msra.mxu2 %v711_v40  ;;  %1080 = vmatpush.msra.mxu1 %v713_v39 }
 0x2e2   :  { %942 = vmatpush.msra.mxu3 %v1626_v0  ;;  %1010 = vmatpush.msra.mxu0 %v1626_v0 }
 0x2e3   :  { %1081 = vmatpush.msra.mxu1 %v711_v40 }
 0x2e4   :  { %943 = vmatpush.msra.mxu3 %v715_v38  ;;  %1011 = vmatpush.msra.mxu0 %v715_v38 }
 0x2e6   :  { %944 = vmatpush.msra.mxu3 %v713_v39  ;;  %1012 = vmatpush.msra.mxu0 %v713_v39 }
 0x2e8   :  { %945 = vmatpush.msra.mxu3 %v711_v40  ;;  %1013 = vmatpush.msra.mxu0 %v711_v40 }
 0x34f   :  { %v385_v45 = vpop.f32.mrf.mxu2 }
 0x350   :  { %v386_v46 = vadd.f32 %v385_v45, %v345_v43 }
 0x352   :  { %v388_v47 = vmax.f32 %v386_v46, 0.0 }
 0x354   :  { %v390_v50 = vrot.slane %v388_v47, 2  ;;  %v393_v51 = vsel %vm392_vm12, %v388_v47, 0.0 }
 0x356   :  { %v394_v52 = vsel %vm392_vm12, %v390_v50, 0.0 }
 0x357   :  { %v395_v54 = vadd.f32 %v394_v52, %v393_v51 }
 0x359   :  { %v403_v56 = vmul.f32 %v402_v53, %v395_v54 }
 0x35a   :  { %v456_v58 = vpop.f32.mrf.mxu3 }
 0x35b   :  { %v457_v59 = vadd.f32 %v456_v58, %v404_v55  ;;  %1243 = vmatmul.msk.f32.vlgmr.msrb.gmra.mxu2 %vm258_vm4, %v403_v56  ;;  %vm722_vm4 = vcmask 261120  }
 0x35c   :  { %1146 = vmatpush.msrb.mxu2 %v1626_v0 }
 0x35d   :  { %1241 = vmatmul.msk.f32.vlgmr.msrb.gmra.mxu1 %vm430_vm10, %v457_v59 }
 0x35e   :  { %1147 = vmatpush.msrb.mxu2 %v715_v38 }
 0x360   :  { %1148 = vmatpush.msrb.mxu2 %v713_v39 }
 0x362   :  { %1149 = vmatpush.msrb.mxu2 %v711_v40  ;;  %v459_v51 = vpop.f32.mrf.mxu3 }
 0x363   :  { %v460_v52 = vadd.f32 %v459_v51, %v404_v55 }
 0x365   :  { %1242 = vmatmul.msk.f32.gmra.mxu1 %vm430_vm10, %v460_v52 }
 0x3da   :  { %v599_v4 = vpop.f32.mrf.mxu1 }
 0x3db   :  { %v600_v5 = vadd.f32 %v599_v4, %v570_v3 }
 0x3dd   :  { %v1638_v6 = vadd.f32 %v605_v2, %v600_v5 }
 0x3de   :  { %v1640_v7 = vpop.f32.mrf.mxu2 }
 0x3df   :  { %v1644_v8 = vadd.f32 %v1640_v7, %v1638_v6  ;;  %v642_v53 = vrot.slane %v1638_v6, 2 }
 0x3e1   :  { %1156 = vst [vmem:[#allocation1] ss:$4 sm:$0xff] %v1644_v8  ;;  %v1244_v9 = vmul.f32 -1.442695, %v1644_v8  ;;  %v655_v54 = vadd.f32 %v642_v53, %v1640_v7 }
 0x3e3   :  { %1289 = vpow2.f32 %v1244_v9 }
 0x3e8   :  { %v1696_v59 = vld.sshfl [vmem:[#allocation1] sm:$0xff pattern:$0x73625140] }
 0x3e9   :  { %v1290_v10 = vpop.eup %1289 }
 0x3ea   :  { %v665_v12 = vadd.f32 1.0, %v1290_v10 }
 0x3ec   :  { %1291 = vrcp.f32 %v665_v12  ;;  %v677_v18 = vand.u32 2147483648, %v665_v12  ;;  %v675_v21 = vand.u32 2147483647, %v665_v12  ;;  %vm671_vm15 = vweird.f32 %v665_v12 }
 0x3ed   :  { %1293 = vtanh.f32 %v1644_v8 }
 0x3ee   :  { %v678_v23 = vor.u32 1.1754944e-38, %v677_v18  ;;  %vm676_vm3 = vcmp.eq.f32.partialorder %v675_v21, 8.507059e+37 }
 0x3f2   :  { %v1292_v14 = vpop.eup %1291 }
 0x3f3   :  { %v667_v15 = vmul.f32 %v1292_v14, %v665_v12  ;;  %vm672_vm14 = vweird.f32 %v1292_v14  ;;  %v1294_v44 = vpop.eup %1293 }
 0x3f4   :  { %vm673_vm0 = vmor %vm671_vm15, %vm672_vm14 }
 0x3f5   :  { %v668_v16 = vsub.f32 1.0, %v667_v15 }
 0x3f7   :  { %v669_v19 = vmul.f32 %v1292_v14, %v668_v16 }
 0x3f9   :  { %v670_v22 = vadd.f32 %v1292_v14, %v669_v19 }
 0x3fb   :  { %v674_v24 = vsel %vm673_vm0, %v1292_v14, %v670_v22 }
 0x3fc   :  { %v679_v25 = vsel %vm676_vm3, %v678_v23, %v674_v24 }
 0x3fd   :  { %683 = vperm.xlu2 %1278, %v679_v25   ;;  %v691_v26 = vsub.f32 1.0, %v679_v25 }
 0x3ff   :  { %695 = vperm.xlu1 %1279, %v691_v26  }
 0x457   :  { %v684_v11 = vpop.permute.xlu2 %683 }
 0x458   :  { %v689_v13 = vperm.slane %v684_v11, %v1594_v28 }
 0x45a   :  { %v690_v45 = vmul.f32 0.0, %v689_v13 }
 0x471   :  { %v696_v42 = vpop.permute.xlu1 %695 }
 0x472   :  { %v701_v43 = vperm.slane %v696_v42, %v1594_v28 }
 0x474   :  { %v702_v46 = vmul.f32 %v1294_v44, %v701_v43 }
 0x476   :  { %v703_v47 = vadd.f32 %v702_v46, %v690_v45 }
 0x478   :  { %1295 = vtanh.f32 %v703_v47 }
 0x47e   :  { %v1296_v49 = vpop.eup %1295 }
 0x47f   :  { %v705_v50 = vmul.f32 %v1296_v49, %v689_v13 }
 0x481   :  { %1245 = vmatmul.msk.f32.vlgmr.msrb.gmra.mxu3 %vm722_vm4, %v705_v50 }
 0x504   :  { %v743_v56 = vpop.f32.mrf.mxu3 }
 0x505   :  { %v746_v58 = vadd.f32 %v743_v56, %v655_v54 }
 0x507   :  { %v1246_v48 = vmul.f32 -1.442695, %v746_v58  ;;  %1162 = vst [vmem:[#allocation1] ss:$4 sm:$0xff] %v746_v58 }
 0x509   :  { %1297 = vpow2.f32 %v1246_v48 }
 0x50e   :  { %v1706_v37 = vld.sshfl [vmem:[#allocation1] sm:$0xff pattern:$0x73625140] }
 0x50f   :  { %v1298_v62 = vpop.eup %1297 }
 0x510   :  { %v750_v63 = vadd.f32 1.0, %v1298_v62 }
 0x512   :  { %1299 = vrcp.f32 %v750_v63  ;;  %v762_v55 = vand.u32 2147483648, %v750_v63  ;;  %v760_v5 = vand.u32 2147483647, %v750_v63  ;;  %vm756_vm6 = vweird.f32 %v750_v63 }
 0x513   :  { %1301 = vtanh.f32 %v746_v58 }
 0x514   :  { %v763_v9 = vor.u32 1.1754944e-38, %v762_v55  ;;  %vm761_vm8 = vcmp.eq.f32.partialorder %v760_v5, 8.507059e+37 }
 0x518   :  { %v1300_v0 = vpop.eup %1299 }
 0x519   :  { %v752_v3 = vmul.f32 %v1300_v0, %v750_v63  ;;  %vm757_vm5 = vweird.f32 %v1300_v0  ;;  %v1302_v21 = vpop.eup %1301 }
 0x51a   :  { %vm758_vm7 = vmor %vm756_vm6, %vm757_vm5 }
 0x51b   :  { %v753_v57 = vsub.f32 1.0, %v752_v3  ;;  %v644_v3 = vrot.slane %v1638_v6, 6 }
 0x51d   :  { %v754_v4 = vmul.f32 %v1300_v0, %v753_v57  ;;  %v657_v57 = vadd.f32 %v644_v3, %v1640_v7 }
 0x51f   :  { %v755_v8 = vadd.f32 %v1300_v0, %v754_v4 }
 0x521   :  { %v759_v10 = vsel %vm758_vm7, %v1300_v0, %v755_v8 }
 0x522   :  { %v764_v12 = vsel %vm761_vm8, %v763_v9, %v759_v10 }
 0x523   :  { %768 = vperm.xlu2 %1278, %v764_v12   ;;  %v776_v14 = vsub.f32 1.0, %v764_v12 }
 0x525   :  { %780 = vperm.xlu0 %1280, %v776_v14  }
 0x52d   :  { %1281 = vset.pattern.permute.xlu0 %v1375_v61 }
 0x52e   :  { %495 = vperm.xlu0 %1281, %v1651_v27   ;;  %v643_v27 = vrot.slane %v1638_v6, 4 }
 0x530   :  { %v656_v32 = vadd.f32 %v643_v27, %v1640_v7 }
 0x536   :  { %1285 = vset.pattern.permute.xlu0 %v1378_v1 }
 0x57d   :  { %v769_v15 = vpop.permute.xlu2 %768 }
 0x57e   :  { %v774_v16 = vperm.slane %v769_v15, %v1594_v28 }
 0x580   :  { %v775_v22 = vmul.f32 %v1296_v49, %v774_v16 }
 0x597   :  { %v781_v18 = vpop.permute.xlu0 %780 }
 0x598   :  { %v786_v19 = vperm.slane %v781_v18, %v1594_v28 }
 0x59a   :  { %v787_v23 = vmul.f32 %v1302_v21, %v786_v19 }
 0x59c   :  { %v788_v24 = vadd.f32 %v787_v23, %v775_v22 }
 0x59e   :  { %1303 = vtanh.f32 %v788_v24 }
 0x5a0   :  { %v496_v27 = vpop.permute.xlu0 %495 }
 0x5a4   :  { %v1304_v25 = vpop.eup %1303 }
 0x5a5   :  { %v790_v26 = vmul.f32 %v1304_v25, %v774_v16 }
 0x5a7   :  { %1247 = vmatmul.msk.f32.vlgmr.msrb.gmra.mxu0 %vm722_vm4, %v790_v26 }
 0x624   :  { %v811_v34 = vpop.f32.mrf.mxu0 }
 0x625   :  { %v814_v36 = vadd.f32 %v811_v34, %v656_v32  ;;  %v501_v34 = vperm.slane %v496_v27, %v1594_v28 }
 0x627   :  { %v1248_v38 = vmul.f32 -1.442695, %v814_v36  ;;  %1168 = vst [vmem:[#allocation1] ss:$4 sm:$0xff] %v814_v36 }
 0x629   :  { %1305 = vpow2.f32 %v1248_v38 }
 0x62e   :  { %v1713_v5 = vld.sshfl [vmem:[#allocation1] sm:$0xff pattern:$0x73625140] }
 0x62f   :  { %v1306_v39 = vpop.eup %1305 }
 0x630   :  { %v818_v40 = vadd.f32 1.0, %v1306_v39 }
 0x632   :  { %1307 = vrcp.f32 %v818_v40  ;;  %v830_v42 = vand.u32 2147483648, %v818_v40  ;;  %v828_v44 = vand.u32 2147483647, %v818_v40  ;;  %vm824_vm11 = vweird.f32 %v818_v40 }
 0x633   :  { %1309 = vtanh.f32 %v814_v36 }
 0x634   :  { %v831_v46 = vor.u32 1.1754944e-38, %v830_v42  ;;  %vm829_vm13 = vcmp.eq.f32.partialorder %v828_v44, 8.507059e+37 }
 0x638   :  { %v1308_v41 = vpop.eup %1307 }
 0x639   :  { %v820_v11 = vmul.f32 %v1308_v41, %v818_v40  ;;  %vm825_vm9 = vweird.f32 %v1308_v41  ;;  %v1310_v56 = vpop.eup %1309 }
 0x63a   :  { %vm826_vm12 = vmor %vm824_vm11, %vm825_vm9 }
 0x63b   :  { %v821_v13 = vsub.f32 1.0, %v820_v11 }
 0x63d   :  { %v822_v43 = vmul.f32 %v1308_v41, %v821_v13 }
 0x63f   :  { %v823_v45 = vadd.f32 %v1308_v41, %v822_v43 }
 0x641   :  { %v827_v47 = vsel %vm826_vm12, %v1308_v41, %v823_v45 }
 0x642   :  { %v832_v49 = vsel %vm829_vm13, %v831_v46, %v827_v47  ;;  %v602_v47 = vpop.f32.mrf.mxu1 }
 0x643   :  { %836 = vperm.xlu1 %1279, %v832_v49   ;;  %v844_v50 = vsub.f32 1.0, %v832_v49 }
 0x645   :  { %848 = vperm.xlu2 %1278, %v844_v50  }
 0x69f   :  { %v849_v51 = vpop.permute.xlu2 %848 }
 0x6a0   :  { %v854_v52 = vperm.slane %v849_v51, %v1594_v28 }
 0x6a2   :  { %v855_v58 = vmul.f32 %v1310_v56, %v854_v52 }
 0x6b5   :  { %v837_v53 = vpop.permute.xlu1 %836 }
 0x6b6   :  { %v842_v54 = vperm.slane %v837_v53, %v1594_v28 }
 0x6b8   :  { %v843_v48 = vmul.f32 %v1304_v25, %v842_v54 }
 0x6ba   :  { %v856_v62 = vadd.f32 %v855_v58, %v843_v48 }
 0x6bc   :  { %1311 = vtanh.f32 %v856_v62 }
 0x6c2   :  { %v1312_v63 = vpop.eup %1311 }
 0x6c3   :  { %v858_v0 = vmul.f32 %v1312_v63, %v842_v54 }
 0x6c5   :  { %1249 = vmatmul.msk.f32.vlgmr.msra.gmra.mxu2 %vm722_vm4, %v858_v0 }
 0x748   :  { %v879_v55 = vpop.f32.mrf.mxu2 }
 0x749   :  { %v882_v4 = vadd.f32 %v879_v55, %v657_v57 }
 0x74b   :  { %v1250_v8 = vmul.f32 -1.442695, %v882_v4  ;;  %1174 = vst [vmem:[#allocation1] ss:$4 sm:$0xff] %v882_v4 }
 0x74d   :  { %1313 = vpow2.f32 %v1250_v8 }
 0x752   :  { %v1175_v53 = vld.sshfl [vmem:[#allocation1] sm:$0xff pattern:$0x73625140] }
 0x753   :  { %v1314_v9 = vpop.eup %1313 }
 0x754   :  { %v886_v10 = vadd.f32 1.0, %v1314_v9 }
 0x756   :  { %1315 = vrcp.f32 %v886_v10  ;;  %v898_v16 = vand.u32 2147483648, %v886_v10  ;;  %v896_v19 = vand.u32 2147483647, %v886_v10  ;;  %vm892_vm15 = vweird.f32 %v886_v10 }
 0x757   :  { %1317 = vtanh.f32 %v882_v4 }
 0x758   :  { %v899_v21 = vor.u32 1.1754944e-38, %v898_v16  ;;  %vm897_vm3 = vcmp.eq.f32.partialorder %v896_v19, 8.507059e+37 }
 0x75c   :  { %v1316_v12 = vpop.eup %1315 }
 0x75d   :  { %v888_v14 = vmul.f32 %v1316_v12, %v886_v10  ;;  %vm893_vm14 = vweird.f32 %v1316_v12  ;;  %v1318_v36 = vpop.eup %1317 }
 0x75e   :  { %vm894_vm0 = vmor %vm892_vm15, %vm893_vm14 }
 0x75f   :  { %v889_v15 = vsub.f32 1.0, %v888_v14 }
 0x761   :  { %v890_v18 = vmul.f32 %v1316_v12, %v889_v15 }
 0x763   :  { %v891_v6 = vadd.f32 %v1316_v12, %v890_v18 }
 0x765   :  { %v895_v22 = vsel %vm894_vm0, %v1316_v12, %v891_v6 }
 0x766   :  { %v900_v23 = vsel %vm897_vm3, %v899_v21, %v895_v22 }
 0x767   :  { %904 = vperm.xlu1 %1279, %v900_v23   ;;  %v912_v24 = vsub.f32 1.0, %v900_v23 }
 0x769   :  { %916 = vperm.xlu2 %1278, %v912_v24  }
 0x76f   :  { %1282 = vset.pattern.permute.xlu1 %v1375_v61 }
 0x770   :  { %503 = vperm.xlu1 %1282, %v1656_v30  }
 0x771   :  { %1283 = vset.pattern.permute.xlu2 %v1375_v61  ;;  %v538_v61 = vmul.f32 %v1590_v20, %v501_v34 }
 0x772   :  { %511 = vperm.xlu2 %1283, %v1661_v31  }
 0x773   :  { %563 = vst [vmem:[#allocation1 + $0x20] ss:$4 sm:$0xff] %v538_v61 }
 0x778   :  { %519 = vperm.xlu1 %1282, %v1669_v33  }
 0x77a   :  { %1284 = vset.pattern.permute.xlu2 %v1378_v1 }
 0x780   :  { %1286 = vset.pattern.permute.xlu1 %v1378_v1 }
 0x7c3   :  { %v917_v25 = vpop.permute.xlu2 %916 }
 0x7c4   :  { %v922_v31 = vperm.slane %v917_v25, %v1594_v28 }
 0x7c6   :  { %v923_v38 = vmul.f32 %v1318_v36, %v922_v31 }
 0x7cc   :  { %v512_v26 = vpop.permute.xlu2 %511 }
 0x7cd   :  { %v517_v32 = vperm.slane %v512_v26, %v1594_v28 }
 0x7cf   :  { %v540_v30 = vmul.f32 %v529_v29, %v517_v32 }
 0x7d1   :  { %567 = vst [vmem:[#allocation1 + $0x22] ss:$4 sm:$0xff] %v540_v30 }
 0x7d9   :  { %v905_v33 = vpop.permute.xlu1 %904 }
 0x7da   :  { %v910_v1 = vperm.slane %v905_v33, %v1594_v28 }
 0x7dc   :  { %v911_v39 = vmul.f32 %v1312_v63, %v910_v1 }
 0x7de   :  { %v924_v40 = vadd.f32 %v923_v38, %v911_v39 }
 0x7e0   :  { %1319 = vtanh.f32 %v924_v40 }
 0x7e2   :  { %v504_v41 = vpop.permute.xlu1 %503 }
 0x7e3   :  { %v509_v11 = vperm.slane %v504_v41, %v1594_v28 }
 0x7e5   :  { %v539_v29 = vmul.f32 %v528_v17, %v509_v11 }
 0x7e6   :  { %v1320_v13 = vpop.eup %1319 }
 0x7e7   :  { %v926_v42 = vmul.f32 %v1320_v13, %v910_v1  ;;  %565 = vst [vmem:[#allocation1 + $0x21] ss:$4 sm:$0xff] %v539_v29 }
 0x7e9   :  { %1251 = vmatmul.msk.f32.vlgmr.msra.gmra.mxu3 %vm722_vm4, %v926_v42 }
 0x7ea   :  { %v520_v43 = vpop.permute.xlu1 %519 }
 0x7eb   :  { %v525_v44 = vperm.slane %v520_v43, %v1594_v28 }
 0x7ed   :  { %v541_v45 = vmul.f32 %v530_v35, %v525_v44 }
 0x7ef   :  { %569 = vst [vmem:[#allocation1 + $0x23] ss:$4 sm:$0xff] %v541_v45 }
 0x7f6   :  { %v571_v46 = vld.sshfl [vmem:[#allocation1 + $0x20] sm:$0xff pattern:$0x73625140] }
 0x7f7   :  { %v603_v49 = vadd.f32 %v602_v47, %v571_v46 }
 0x7f9   :  { %v1738_v50 = vadd.f32 %v605_v2, %v603_v49 }
 0x7fb   :  { %v658_v17 = vadd.f32 %v1640_v7, %v1738_v50  ;;  %v646_v47 = vrot.slane %v1738_v50, 4 }
 0x7fd   :  { %v660_v49 = vadd.f32 %v646_v47, %v1640_v7 }
 0x86c   :  { %v947_v51 = vpop.f32.mrf.mxu3 }
 0x86d   :  { %v950_v52 = vadd.f32 %v947_v51, %v658_v17 }
 0x86f   :  { %v1252_v54 = vmul.f32 -1.442695, %v950_v52  ;;  %1180 = vst [vmem:[#allocation1] ss:$4 sm:$0xff] %v950_v52 }
 0x871   :  { %1321 = vpow2.f32 %v1252_v54 }
 0x876   :  { %v1748_v23 = vld.sshfl [vmem:[#allocation1] sm:$0xff pattern:$0x73625140] }
 0x877   :  { %v1322_v56 = vpop.eup %1321 }
 0x878   :  { %v954_v20 = vadd.f32 1.0, %v1322_v56 }
 0x87a   :  { %1323 = vrcp.f32 %v954_v20  ;;  %v966_v62 = vand.u32 2147483648, %v954_v20  ;;  %v964_v60 = vand.u32 2147483647, %v954_v20  ;;  %vm960_vm6 = vweird.f32 %v954_v20 }
 0x87b   :  { %1325 = vtanh.f32 %v950_v52 }
 0x87c   :  { %v967_v0 = vor.u32 1.1754944e-38, %v966_v62  ;;  %vm965_vm8 = vcmp.eq.f32.partialorder %v964_v60, 8.507059e+37 }
 0x880   :  { %v1324_v35 = vpop.eup %1323 }
 0x881   :  { %v956_v58 = vmul.f32 %v1324_v35, %v954_v20  ;;  %vm961_vm5 = vweird.f32 %v1324_v35  ;;  %v1326_v12 = vpop.eup %1325 }
 0x882   :  { %vm962_vm7 = vmor %vm960_vm6, %vm961_vm5  ;;  %vm1203_vm5 = vcmask 7168   ;;  %vm1205_vm6 = vcmask 15360  }
 0x883   :  { %v957_v48 = vsub.f32 1.0, %v956_v58 }
 0x885   :  { %v958_v63 = vmul.f32 %v1324_v35, %v957_v48 }
 0x887   :  { %v959_v2 = vadd.f32 %v1324_v35, %v958_v63 }
 0x889   :  { %v963_v3 = vsel %vm962_vm7, %v1324_v35, %v959_v2  ;;  %vm1212_vm7 = vcmask 56320  }
 0x88a   :  { %v968_v57 = vsel %vm965_vm8, %v967_v0, %v963_v3  ;;  %vm1214_vm8 = vcmask 58368  }
 0x88b   :  { %972 = vperm.xlu2 %1284, %v968_v57   ;;  %v980_v55 = vsub.f32 1.0, %v968_v57 }
 0x88d   :  { %984 = vperm.xlu0 %1285, %v980_v55  }
 0x895   :  { %1158 = vrot.lane.b32.xlu0 %v1696_v59, %s1379_s0  ;;  %v645_v59 = vrot.slane %v1738_v50, 2 }
 0x897   :  { %v659_v6 = vadd.f32 %v645_v59, %v1640_v7 }
 0x89d   :  { %1176 = vrot.lane.b32.xlu0 %v1175_v53, %s1380_s3 }
 0x8e5   :  { %v973_v4 = vpop.permute.xlu2 %972 }
 0x8e6   :  { %v978_v8 = vperm.slane %v973_v4, %v1594_v28 }
 0x8e8   :  { %v979_v14 = vmul.f32 %v1320_v13, %v978_v8 }
 0x8ff   :  { %v985_v9 = vpop.permute.xlu0 %984 }
 0x900   :  { %v990_v10 = vperm.slane %v985_v9, %v1594_v28 }
 0x902   :  { %v991_v15 = vmul.f32 %v1326_v12, %v990_v10 }
 0x904   :  { %v992_v16 = vadd.f32 %v991_v15, %v979_v14 }
 0x906   :  { %1327 = vtanh.f32 %v992_v16 }
 0x90c   :  { %v1328_v18 = vpop.eup %1327 }
 0x90d   :  { %v994_v19 = vmul.f32 %v1328_v18, %v978_v8 }
 0x90f   :  { %1253 = vmatmul.msk.f32.vlgmr.msra.gmra.mxu0 %vm722_vm4, %v994_v19 }
 0x98c   :  { %v1015_v21 = vpop.f32.mrf.mxu0 }
 0x98d   :  { %v1018_v22 = vadd.f32 %v1015_v21, %v659_v6 }
 0x98f   :  { %v1254_v24 = vmul.f32 -1.442695, %v1018_v22  ;;  %1186 = vst [vmem:[#allocation1] ss:$4 sm:$0xff] %v1018_v22 }
 0x991   :  { %1329 = vpow2.f32 %v1254_v24 }
 0x996   :  { %v1187_v52 = vld.sshfl [vmem:[#allocation1] sm:$0xff pattern:$0x73625140] }
 0x997   :  { %v1330_v25 = vpop.eup %1329 }
 0x998   :  { %v1022_v26 = vadd.f32 1.0, %v1330_v25 }
 0x99a   :  { %1331 = vrcp.f32 %v1022_v26  ;;  %v1034_v30 = vand.u32 2147483648, %v1022_v26  ;;  %v1032_v31 = vand.u32 2147483647, %v1022_v26  ;;  %vm1028_vm11 = vweird.f32 %v1022_v26 }
 0x99b   :  { %1333 = vtanh.f32 %v1018_v22 }
 0x99c   :  { %v1035_v1 = vor.u32 1.1754944e-38, %v1034_v30  ;;  %vm1033_vm13 = vcmp.eq.f32.partialorder %v1032_v31, 8.507059e+37 }
 0x9a0   :  { %v1332_v27 = vpop.eup %1331 }
 0x9a1   :  { %v1024_v32 = vmul.f32 %v1332_v27, %v1022_v26  ;;  %vm1029_vm9 = vweird.f32 %v1332_v27  ;;  %v1334_v13 = vpop.eup %1333 }
 0x9a2   :  { %vm1030_vm12 = vmor %vm1028_vm11, %vm1029_vm9 }
 0x9a3   :  { %v1025_v34 = vsub.f32 1.0, %v1024_v32 }
 0x9a5   :  { %v1026_v61 = vmul.f32 %v1332_v27, %v1025_v34 }
 0x9a7   :  { %v1027_v33 = vadd.f32 %v1332_v27, %v1026_v61 }
 0x9a9   :  { %v1031_v36 = vsel %vm1030_vm12, %v1332_v27, %v1027_v33 }
 0x9aa   :  { %v1036_v38 = vsel %vm1033_vm13, %v1035_v1, %v1031_v36 }
 0x9ab   :  { %1040 = vperm.xlu1 %1286, %v1036_v38   ;;  %v1048_v39 = vsub.f32 1.0, %v1036_v38 }
 0x9ad   :  { %1052 = vperm.xlu2 %1284, %v1048_v39  }
 0xa07   :  { %v1053_v40 = vpop.permute.xlu2 %1052 }
 0xa08   :  { %v1058_v41 = vperm.slane %v1053_v40, %v1594_v28 }
 0xa0a   :  { %v1059_v42 = vmul.f32 %v1334_v13, %v1058_v41 }
 0xa1d   :  { %v1041_v11 = vpop.permute.xlu1 %1040 }
 0xa1e   :  { %v1046_v29 = vperm.slane %v1041_v11, %v1594_v28 }
 0xa20   :  { %v1047_v43 = vmul.f32 %v1328_v18, %v1046_v29 }
 0xa22   :  { %v1060_v44 = vadd.f32 %v1059_v42, %v1047_v43 }
 0xa24   :  { %1335 = vtanh.f32 %v1060_v44 }
 0xa2a   :  { %v1336_v45 = vpop.eup %1335 }
 0xa2b   :  { %v1062_v46 = vmul.f32 %v1336_v45, %v1046_v29 }
 0xa2d   :  { %1255 = vmatmul.msk.f32.vlgmr.msra.gmra.mxu1 %vm722_vm4, %v1062_v46 }
 0xaaa   :  { %v1083_v17 = vpop.f32.mrf.mxu1 }
 0xaab   :  { %v1086_v51 = vadd.f32 %v1083_v17, %v660_v49 }
 0xaad   :  { %v1256_v53 = vmul.f32 -1.442695, %v1086_v51  ;;  %1192 = vst [vmem:[#allocation1] ss:$4 sm:$0xff] %v1086_v51 }
 0xaaf   :  { %1337 = vpow2.f32 %v1256_v53 }
 0xab4   :  { %v1193_v54 = vld.sshfl [vmem:[#allocation1] sm:$0xff pattern:$0x73625140] }
 0xab5   :  { %v1338_v56 = vpop.eup %1337  ;;  %1194 = vrot.lane.b32.xlu0 %v1193_v54, %s1381_s17 }
 0xab6   :  { %v1090_v20 = vadd.f32 1.0, %v1338_v56 }
 0xab8   :  { %1339 = vrcp.f32 %v1090_v20  ;;  %v1102_v62 = vand.u32 2147483648, %v1090_v20  ;;  %v1100_v60 = vand.u32 2147483647, %v1090_v20  ;;  %vm1096_vm15 = vweird.f32 %v1090_v20 }
 0xab9   :  { %1341 = vtanh.f32 %v1086_v51 }
 0xaba   :  { %v1103_v0 = vor.u32 1.1754944e-38, %v1102_v62  ;;  %vm1101_vm3 = vcmp.eq.f32.partialorder %v1100_v60, 8.507059e+37 }
 0xabe   :  { %v1340_v35 = vpop.eup %1339 }
 0xabf   :  { %v1092_v58 = vmul.f32 %v1340_v35, %v1090_v20  ;;  %vm1097_vm14 = vweird.f32 %v1340_v35  ;;  %v1342_v12 = vpop.eup %1341 }
 0xac0   :  { %vm1098_vm0 = vmor %vm1096_vm15, %vm1097_vm14 }
 0xac1   :  { %v1093_v48 = vsub.f32 1.0, %v1092_v58 }
 0xac3   :  { %v1094_v63 = vmul.f32 %v1340_v35, %v1093_v48 }
 0xac5   :  { %v1095_v2 = vadd.f32 %v1340_v35, %v1094_v63 }
 0xac7   :  { %v1099_v3 = vsel %vm1098_vm0, %v1340_v35, %v1095_v2 }
 0xac8   :  { %v1104_v57 = vsel %vm1101_vm3, %v1103_v0, %v1099_v3 }
 0xac9   :  { %1108 = vperm.xlu1 %1286, %v1104_v57   ;;  %v1116_v55 = vsub.f32 1.0, %v1104_v57 }
 0xacb   :  { %1120 = vperm.xlu2 %1284, %v1116_v55  }
 0xad1   :  { %1164 = vrot.lane.b32.xlu1 %v1706_v37, %s1382_s18 }
 0xad3   :  { %1170 = vrot.lane.b32.xlu2 %v1713_v5, %s1383_s20  ;;  %v647_v5 = vrot.slane %v1738_v50, 6 }
 0xad5   :  { %v661_v19 = vadd.f32 %v647_v5, %v1640_v7 }
 0xad9   :  { %1182 = vrot.lane.b32.xlu1 %v1748_v23, %s1384_s21 }
 0xadb   :  { %1188 = vrot.lane.b32.xlu2 %v1187_v52, %s1385_s23 }
 0xb25   :  { %v1121_v4 = vpop.permute.xlu2 %1120 }
 0xb26   :  { %v1126_v8 = vperm.slane %v1121_v4, %v1594_v28 }
 0xb28   :  { %v1127_v14 = vmul.f32 %v1342_v12, %v1126_v8 }
 0xb2d   :  { %v1171_v23 = vpop.permute.xlu2 %1170 }
 0xb35   :  { %v1189_v50 = vpop.permute.xlu2 %1188 }
 0xb3b   :  { %v1109_v9 = vpop.permute.xlu1 %1108 }
 0xb3c   :  { %v1114_v10 = vperm.slane %v1109_v9, %v1594_v28  ;;  %v1159_v28 = vpop.permute.xlu0 %1158 }
 0xb3e   :  { %v1115_v15 = vmul.f32 %v1336_v45, %v1114_v10 }
 0xb40   :  { %v1128_v16 = vadd.f32 %v1127_v14, %v1115_v15 }
 0xb42   :  { %1343 = vtanh.f32 %v1128_v16 }
 0xb43   :  { %v1165_v22 = vpop.permute.xlu1 %1164 }
 0xb44   :  { %v1204_v24 = vsel %vm1203_vm5, %v1159_v28, %v1165_v22  ;;  %v1177_v26 = vpop.permute.xlu0 %1176 }
 0xb45   :  { %v1206_v25 = vsel %vm1205_vm6, %v1204_v24, %v1171_v23 }
 0xb46   :  { %v1207_v32 = vsel %vm122_vm1, %v1206_v25, %v1177_v26 }
 0xb48   :  { %v1344_v37 = vpop.eup %1343 }
 0xb49   :  { %v1130_v18 = vmul.f32 %v1344_v37, %v1114_v10 }
 0xb4b   :  { %1257 = vmatmul.msk.f32.vlgmr.msrb.gmra.mxu2 %vm722_vm4, %v1130_v18  ;;  %v1183_v27 = vpop.permute.xlu1 %1182  ;;  %vm1209_vm4 = vcmask 39936  }
 0xb4c   :  { %v1208_v7 = vsel %vm430_vm10, %v1207_v32, %v1183_v27  ;;  %v1195_v30 = vpop.permute.xlu0 %1194 }
 0xb4d   :  { %v1210_v34 = vsel %vm1209_vm4, %v1208_v7, %v1189_v50 }
 0xb4e   :  { %v1211_v31 = vsel %vm131_vm2, %v1210_v34, %v1195_v30 }
 0xbce   :  { %v1151_v59 = vpop.f32.mrf.mxu2 }
 0xbcf   :  { %v1154_v6 = vadd.f32 %v1151_v59, %v661_v19 }
 0xbd1   :  { %1198 = vst [vmem:[#allocation1] ss:$4 sm:$0xff] %v1154_v6 }
 0xbd8   :  { %v1199_v21 = vld.sshfl [vmem:[#allocation1] sm:$0xff pattern:$0x73625140] }
 0xbd9   :  { %1200 = vrot.lane.b32.xlu1 %v1199_v21, %s1386_s24 }
 0xc4b   :  { %v1201_v61 = vpop.permute.xlu1 %1200 }
 0xc4c   :  { %v1213_v33 = vsel %vm1212_vm7, %v1211_v31, %v1201_v61 }
 0xc4d   :  { %1215 = vst.msk [vmem:[#allocation2] sm:$0x3] %vm1214_vm8, %v1213_v33 }
 0xc4e   :  { %1226 = dma.vmem_to_hbm [thread:$0]  %s1222_s25, 32, %s1224_s1, [#allocation3]  }
 0xc4f   :  { %1369 = dma.done.wait [#allocation3], 32  }
 0xc50   :  { %1370 = vsyncadd [#allocation3], 4294967264 }
 0xc51   :  { %1231 = vsyncpa [#allocation3], 1 }

</bundles_post_ra>
